<compile_context>
chip_gen: v7x
topology: tpu7x:2x2x1
jax: 0.10.0
libtpu: 0.0.40
codegen_flags: <defaults>
</compile_context>

<pallas_src>
import jax
import jax.numpy as jnp
import numpy as np
from jax.experimental import pallas as pl
from jax.experimental.pallas import tpu as pltpu


def make_kernel(Cp, NS, Wp, n_valid, eps, compute_dtype):
    inv_count = 1.0 / float(n_valid)
    # Conv tap offsets in the flattened padded-spatial (lane) index.
    deltas = [(dy - 1) * Wp + (dx - 1) for dy in range(3) for dx in range(3)]

    def conv3x3(x_f32, w_ref):
        # Tap-accumulate: 9 static lane rolls + 9 small MXU matmuls, f32 acc.
        # Spatial zero-padding guarantees rolled wrap-around never reaches an
        # interior output lane (min interior flat index is Wp+1).
        acc = None
        for t, d in enumerate(deltas):
            tap = x_f32 if d == 0 else pltpu.roll(x_f32, shift=(-d) % NS, axis=1)
            part = jnp.dot(w_ref[t], tap.astype(compute_dtype),
                           preferred_element_type=jnp.float32)
            acc = part if acc is None else acc + part
        return acc                                         # (Cp, NS) f32

    def batchnorm(h, mask, gamma, beta):
        # One-pass batch stats over the n_valid interior pixels per channel.
        hm = h * mask
        mean = jnp.sum(hm, axis=1, keepdims=True) * inv_count      # (Cp, 1)
        ex2 = jnp.sum(hm * h, axis=1, keepdims=True) * inv_count   # (Cp, 1)
        var = ex2 - mean * mean
        scale = gamma * jax.lax.rsqrt(var + eps)                   # (Cp, 1)
        shift = beta - mean * scale                                # (Cp, 1)
        return h * scale + shift          # one fused per-lane multiply-add

    def kernel(x_ref, mask_ref, w1_ref, w2_ref, bn_ref, o_ref):
        mask = mask_ref[...]                       # (1, NS) f32
        x_f32 = x_ref[...]                         # (Cp, NS) f32 (residual)

        # Hoisted per-channel BN parameters (conv biases omitted: they cancel
        # exactly under train-mode BatchNorm).
        g1, be1 = bn_ref[:, 0:1], bn_ref[:, 1:2]
        g2, be2 = bn_ref[:, 2:3], bn_ref[:, 3:4]

        # conv1 -> bn1 -> relu; mask so a1 is an exactly zero-padded conv2
        # input (the roll-as-halo trick requires zero non-interior lanes).
        h1 = conv3x3(x_f32, w1_ref)
        a1 = jnp.maximum(batchnorm(h1, mask, g1, be1), 0.0) * mask

        # conv2 -> bn2 (no output mask: non-interior lanes are discarded by
        # the host-side slice).
        h2 = conv3x3(a1, w2_ref)
        y2 = batchnorm(h2, mask, g2, be2)

        # residual add + final relu; lane-dense unmasked store.
        o_ref[...] = jnp.maximum(y2 + x_f32, 0.0)

    return kernel


def residual_block_pallas(x_nchw, params, compute_dtype=jnp.float32):
    """Fused ResidualBlock forward.  compute_dtype=bf16 enables the bf16-MXU
    path (f32 accumulation) for v6e/v7x; keep the default f32 on v5e."""
    N, C, H, W = x_nchw.shape
    Hp, Wp = H + 2, W + 2
    S = N * Hp * Wp
    NS = ((S + 127) // 128) * 128            # lane axis: multiple of 128
    Cp = ((C + 7) // 8) * 8                  # sublane axis: full f32 tiles
    eps = 1e-5

    # ---- layout plumbing: channels on sublanes, padded spatial on lanes ----
    x_pad = jnp.pad(x_nchw.astype(jnp.float32),
                    ((0, 0), (0, 0), (1, 1), (1, 1)))          # (N, C, Hp, Wp)
    x_slab = jnp.transpose(x_pad, (1, 0, 2, 3)).reshape(C, S)
    x_slab = jnp.pad(x_slab, ((0, Cp - C), (0, NS - S)))       # (Cp, NS) f32

    # Interior-pixel mask: a single (1, NS) row, broadcast in-kernel.
    mask = jnp.zeros((N, Hp, Wp), jnp.float32).at[:, 1:H + 1, 1:W + 1].set(1.0)
    mask = jnp.pad(mask.reshape(1, S), ((0, 0), (0, NS - S)))

    def as_taps(w):   # (3,3,Cin,Cout) HWIO -> (9, Cp_out, Cp_in) tap matrices
        wt = jnp.transpose(w.reshape(9, C, C), (0, 2, 1))      # (9, cout, cin)
        wt = jnp.pad(wt, ((0, 0), (0, Cp - C), (0, Cp - C)))
        return wt.astype(compute_dtype)

    # Per-channel BN params packed into one (Cp, 4) f32 array:
    # columns = [gamma1, beta1, gamma2, beta2].
    bn_pack = jnp.stack([params["g1"], params["be1"],
                         params["g2"], params["be2"]], axis=1)
    bn_pack = jnp.pad(bn_pack, ((0, Cp - C), (0, 0))).astype(jnp.float32)

    args = (x_slab, mask, as_taps(params["w1"]), as_taps(params["w2"]), bn_pack)

    out = pl.pallas_call(
        make_kernel(Cp, NS, Wp, N * H * W, eps, compute_dtype),
        out_shape=jax.ShapeDtypeStruct((Cp, NS), jnp.float32),
        in_specs=[pl.BlockSpec(memory_space=pltpu.MemorySpace.VMEM)] * len(args),
        out_specs=pl.BlockSpec(memory_space=pltpu.MemorySpace.VMEM),
        compiler_params=pltpu.CompilerParams(
            # Above the 32 MiB scoped default (v5e/v6e benefit from larger
            # future tiles) yet under v7x's 64 MiB physical VMEM.
            vmem_limit_bytes=48 * 1024 * 1024),
    )(*args)

    out = out[:C, :S].reshape(C, N, Hp, Wp)[:, :, 1:H + 1, 1:W + 1]
    return jnp.transpose(out, (1, 0, 2, 3))


# ---- pure-JAX reference (with conv biases) for verification ----
def residual_block_ref(x, params):
    eps = 1e-5

    def conv(x, w, b):
        y = jax.lax.conv_general_dilated(
            x, w, (1, 1), ((1, 1), (1, 1)),
            dimension_numbers=("NCHW", "HWIO", "NCHW"),
            precision=jax.lax.Precision.HIGHEST)
        return y + b[None, :, None, None]

    def bn(x, g, b):
        mean = x.mean(axis=(0, 2, 3), keepdims=True)
        var = x.var(axis=(0, 2, 3), keepdims=True)   # biased, like PyTorch norm
        return ((x - mean) * jax.lax.rsqrt(var + eps)
                * g[None, :, None, None] + b[None, :, None, None])

    h = jax.nn.relu(bn(conv(x, params["w1"], params["b1"]),
                       params["g1"], params["be1"]))
    h = bn(conv(h, params["w2"], params["b2"]), params["g2"], params["be2"])
    return jax.nn.relu(h + x)


if __name__ == "__main__":
    N, C, H, W = 2, 4, 16, 16
    key = jax.random.PRNGKey(0)
    ks = jax.random.split(key, 9)

    params = {
        "w1": jax.random.normal(ks[0], (3, 3, C, C), jnp.float32) * 0.3,
        "b1": jax.random.normal(ks[1], (C,), jnp.float32) * 0.1,
        "g1": 1.0 + 0.2 * jax.random.normal(ks[2], (C,), jnp.float32),
        "be1": 0.1 * jax.random.normal(ks[3], (C,), jnp.float32),
        "w2": jax.random.normal(ks[4], (3, 3, C, C), jnp.float32) * 0.3,
        "b2": jax.random.normal(ks[5], (C,), jnp.float32) * 0.1,
        "g2": 1.0 + 0.2 * jax.random.normal(ks[6], (C,), jnp.float32),
        "be2": 0.1 * jax.random.normal(ks[7], (C,), jnp.float32),
    }
    x = jax.random.normal(ks[8], (N, C, H, W), jnp.float32)

    ref = jax.block_until_ready(residual_block_ref(x, params))

    # f32 path: exact module numerics (bias cancellation under train-mode BN).
    out = jax.block_until_ready(residual_block_pallas(x, params))
    assert out.shape == (N, C, H, W), out.shape
    np.testing.assert_allclose(np.asarray(out), np.asarray(ref),
                               rtol=2e-3, atol=2e-3)

    # bf16-MXU path (v6e/v7x): only matmul operands are bf16; loose tolerance.
    out_bf16 = jax.block_until_ready(
        residual_block_pallas(x, params, compute_dtype=jnp.bfloat16))
    np.testing.assert_allclose(np.asarray(out_bf16), np.asarray(ref),
                               rtol=5e-2, atol=1e-1)

    print("KERNEL_OK")
</pallas_src>

<mosaic_0001>
module attributes {stable_mosaic.version = 11 : i64} {
  func.func @kernel(%arg0: memref<8x768xf32, #tpu.memory_space<vmem>>, %arg1: memref<1x768xf32, #tpu.memory_space<vmem>>, %arg2: memref<9x8x8xf32, #tpu.memory_space<vmem>>, %arg3: memref<9x8x8xf32, #tpu.memory_space<vmem>>, %arg4: memref<8x4xf32, #tpu.memory_space<vmem>>, %arg5: memref<8x768xf32, #tpu.memory_space<vmem>>) attributes {dimension_semantics = [], scalar_prefetch = 0 : i64, scratch_operands = 0 : i64, tpu.core_type = #tpu.core_type<tc>} {
    %c0 = arith.constant 0 : index
    %c0_0 = arith.constant 0 : index
    %0 = vector.load %arg1[%c0, %c0_0] : memref<1x768xf32, #tpu.memory_space<vmem>>, vector<1x768xf32>
    %c0_1 = arith.constant 0 : index
    %c0_2 = arith.constant 0 : index
    %1 = vector.load %arg0[%c0_1, %c0_2] : memref<8x768xf32, #tpu.memory_space<vmem>>, vector<8x768xf32>
    %c0_3 = arith.constant 0 : index
    %c0_4 = arith.constant 0 : index
    %2 = vector.load %arg4[%c0_3, %c0_4] : memref<8x4xf32, #tpu.memory_space<vmem>>, vector<8x1xf32>
    %c0_5 = arith.constant 0 : index
    %c1 = arith.constant 1 : index
    %3 = vector.load %arg4[%c0_5, %c1] : memref<8x4xf32, #tpu.memory_space<vmem>>, vector<8x1xf32>
    %c0_6 = arith.constant 0 : index
    %c2 = arith.constant 2 : index
    %4 = vector.load %arg4[%c0_6, %c2] : memref<8x4xf32, #tpu.memory_space<vmem>>, vector<8x1xf32>
    %c0_7 = arith.constant 0 : index
    %c3 = arith.constant 3 : index
    %5 = vector.load %arg4[%c0_7, %c3] : memref<8x4xf32, #tpu.memory_space<vmem>>, vector<8x1xf32>
    %c19_i32 = arith.constant 19 : i32
    %6 = tpu.dynamic_rotate %1 by %c19_i32 dim 1 : vector<8x768xf32>, i32 -> vector<8x768xf32>
    %c0_8 = arith.constant 0 : index
    %c0_9 = arith.constant 0 : index
    %c0_10 = arith.constant 0 : index
    %7 = vector.load %arg2[%c0_8, %c0_9, %c0_10] : memref<9x8x8xf32, #tpu.memory_space<vmem>>, vector<1x8x8xf32>
    %8 = vector.shape_cast %7 : vector<1x8x8xf32> to vector<8x8xf32>
    %cst = arith.constant dense<0.000000e+00> : vector<8x768xf32>
    %9 = tpu.matmul %8, %6, %cst {dimension_numbers = #tpu.dot_dimension_numbers<[1], [0], [0], [1], [0, 0, 1, 1], [], []>} : vector<8x8xf32>, vector<8x768xf32>, vector<8x768xf32> -> vector<8x768xf32>
    %c18_i32 = arith.constant 18 : i32
    %10 = tpu.dynamic_rotate %1 by %c18_i32 dim 1 : vector<8x768xf32>, i32 -> vector<8x768xf32>
    %c1_11 = arith.constant 1 : index
    %c0_12 = arith.constant 0 : index
    %c0_13 = arith.constant 0 : index
    %11 = vector.load %arg2[%c1_11, %c0_12, %c0_13] : memref<9x8x8xf32, #tpu.memory_space<vmem>>, vector<1x8x8xf32>
    %12 = vector.shape_cast %11 : vector<1x8x8xf32> to vector<8x8xf32>
    %cst_14 = arith.constant dense<0.000000e+00> : vector<8x768xf32>
    %13 = tpu.matmul %12, %10, %cst_14 {dimension_numbers = #tpu.dot_dimension_numbers<[1], [0], [0], [1], [0, 0, 1, 1], [], []>} : vector<8x8xf32>, vector<8x768xf32>, vector<8x768xf32> -> vector<8x768xf32>
    %14 = arith.addf %9, %13 : vector<8x768xf32>
    %c17_i32 = arith.constant 17 : i32
    %15 = tpu.dynamic_rotate %1 by %c17_i32 dim 1 : vector<8x768xf32>, i32 -> vector<8x768xf32>
    %c2_15 = arith.constant 2 : index
    %c0_16 = arith.constant 0 : index
    %c0_17 = arith.constant 0 : index
    %16 = vector.load %arg2[%c2_15, %c0_16, %c0_17] : memref<9x8x8xf32, #tpu.memory_space<vmem>>, vector<1x8x8xf32>
    %17 = vector.shape_cast %16 : vector<1x8x8xf32> to vector<8x8xf32>
    %cst_18 = arith.constant dense<0.000000e+00> : vector<8x768xf32>
    %18 = tpu.matmul %17, %15, %cst_18 {dimension_numbers = #tpu.dot_dimension_numbers<[1], [0], [0], [1], [0, 0, 1, 1], [], []>} : vector<8x8xf32>, vector<8x768xf32>, vector<8x768xf32> -> vector<8x768xf32>
    %19 = arith.addf %14, %18 : vector<8x768xf32>
    %c1_i32 = arith.constant 1 : i32
    %20 = tpu.dynamic_rotate %1 by %c1_i32 dim 1 : vector<8x768xf32>, i32 -> vector<8x768xf32>
    %c3_19 = arith.constant 3 : index
    %c0_20 = arith.constant 0 : index
    %c0_21 = arith.constant 0 : index
    %21 = vector.load %arg2[%c3_19, %c0_20, %c0_21] : memref<9x8x8xf32, #tpu.memory_space<vmem>>, vector<1x8x8xf32>
    %22 = vector.shape_cast %21 : vector<1x8x8xf32> to vector<8x8xf32>
    %cst_22 = arith.constant dense<0.000000e+00> : vector<8x768xf32>
    %23 = tpu.matmul %22, %20, %cst_22 {dimension_numbers = #tpu.dot_dimension_numbers<[1], [0], [0], [1], [0, 0, 1, 1], [], []>} : vector<8x8xf32>, vector<8x768xf32>, vector<8x768xf32> -> vector<8x768xf32>
    %24 = arith.addf %19, %23 : vector<8x768xf32>
    %c4 = arith.constant 4 : index
    %c0_23 = arith.constant 0 : index
    %c0_24 = arith.constant 0 : index
    %25 = vector.load %arg2[%c4, %c0_23, %c0_24] : memref<9x8x8xf32, #tpu.memory_space<vmem>>, vector<1x8x8xf32>
    %26 = vector.shape_cast %25 : vector<1x8x8xf32> to vector<8x8xf32>
    %cst_25 = arith.constant dense<0.000000e+00> : vector<8x768xf32>
    %27 = tpu.matmul %26, %1, %cst_25 {dimension_numbers = #tpu.dot_dimension_numbers<[1], [0], [0], [1], [0, 0, 1, 1], [], []>} : vector<8x8xf32>, vector<8x768xf32>, vector<8x768xf32> -> vector<8x768xf32>
    %28 = arith.addf %24, %27 : vector<8x768xf32>
    %c767_i32 = arith.constant 767 : i32
    %29 = tpu.dynamic_rotate %1 by %c767_i32 dim 1 : vector<8x768xf32>, i32 -> vector<8x768xf32>
    %c5 = arith.constant 5 : index
    %c0_26 = arith.constant 0 : index
    %c0_27 = arith.constant 0 : index
    %30 = vector.load %arg2[%c5, %c0_26, %c0_27] : memref<9x8x8xf32, #tpu.memory_space<vmem>>, vector<1x8x8xf32>
    %31 = vector.shape_cast %30 : vector<1x8x8xf32> to vector<8x8xf32>
    %cst_28 = arith.constant dense<0.000000e+00> : vector<8x768xf32>
    %32 = tpu.matmul %31, %29, %cst_28 {dimension_numbers = #tpu.dot_dimension_numbers<[1], [0], [0], [1], [0, 0, 1, 1], [], []>} : vector<8x8xf32>, vector<8x768xf32>, vector<8x768xf32> -> vector<8x768xf32>
    %33 = arith.addf %28, %32 : vector<8x768xf32>
    %c751_i32 = arith.constant 751 : i32
    %34 = tpu.dynamic_rotate %1 by %c751_i32 dim 1 : vector<8x768xf32>, i32 -> vector<8x768xf32>
    %c6 = arith.constant 6 : index
    %c0_29 = arith.constant 0 : index
    %c0_30 = arith.constant 0 : index
    %35 = vector.load %arg2[%c6, %c0_29, %c0_30] : memref<9x8x8xf32, #tpu.memory_space<vmem>>, vector<1x8x8xf32>
    %36 = vector.shape_cast %35 : vector<1x8x8xf32> to vector<8x8xf32>
    %cst_31 = arith.constant dense<0.000000e+00> : vector<8x768xf32>
    %37 = tpu.matmul %36, %34, %cst_31 {dimension_numbers = #tpu.dot_dimension_numbers<[1], [0], [0], [1], [0, 0, 1, 1], [], []>} : vector<8x8xf32>, vector<8x768xf32>, vector<8x768xf32> -> vector<8x768xf32>
    %38 = arith.addf %33, %37 : vector<8x768xf32>
    %c750_i32 = arith.constant 750 : i32
    %39 = tpu.dynamic_rotate %1 by %c750_i32 dim 1 : vector<8x768xf32>, i32 -> vector<8x768xf32>
    %c7 = arith.constant 7 : index
    %c0_32 = arith.constant 0 : index
    %c0_33 = arith.constant 0 : index
    %40 = vector.load %arg2[%c7, %c0_32, %c0_33] : memref<9x8x8xf32, #tpu.memory_space<vmem>>, vector<1x8x8xf32>
    %41 = vector.shape_cast %40 : vector<1x8x8xf32> to vector<8x8xf32>
    %cst_34 = arith.constant dense<0.000000e+00> : vector<8x768xf32>
    %42 = tpu.matmul %41, %39, %cst_34 {dimension_numbers = #tpu.dot_dimension_numbers<[1], [0], [0], [1], [0, 0, 1, 1], [], []>} : vector<8x8xf32>, vector<8x768xf32>, vector<8x768xf32> -> vector<8x768xf32>
    %43 = arith.addf %38, %42 : vector<8x768xf32>
    %c749_i32 = arith.constant 749 : i32
    %44 = tpu.dynamic_rotate %1 by %c749_i32 dim 1 : vector<8x768xf32>, i32 -> vector<8x768xf32>
    %c8 = arith.constant 8 : index
    %c0_35 = arith.constant 0 : index
    %c0_36 = arith.constant 0 : index
    %45 = vector.load %arg2[%c8, %c0_35, %c0_36] : memref<9x8x8xf32, #tpu.memory_space<vmem>>, vector<1x8x8xf32>
    %46 = vector.shape_cast %45 : vector<1x8x8xf32> to vector<8x8xf32>
    %cst_37 = arith.constant dense<0.000000e+00> : vector<8x768xf32>
    %47 = tpu.matmul %46, %44, %cst_37 {dimension_numbers = #tpu.dot_dimension_numbers<[1], [0], [0], [1], [0, 0, 1, 1], [], []>} : vector<8x8xf32>, vector<8x768xf32>, vector<8x768xf32> -> vector<8x768xf32>
    %48 = arith.addf %43, %47 : vector<8x768xf32>
    %49 = vector.broadcast %0 : vector<1x768xf32> to vector<8x768xf32>
    %50 = arith.mulf %48, %49 : vector<8x768xf32>
    %cst_38 = arith.constant dense<0.000000e+00> : vector<8xf32>
    %51 = vector.multi_reduction <add>, %50, %cst_38 [1] : vector<8x768xf32> to vector<8xf32>
    %52 = vector.shape_cast %51 : vector<8xf32> to vector<8x1xf32>
    %cst_39 = arith.constant 0.001953125 : f32
    %53 = vector.broadcast %cst_39 : f32 to vector<8x1xf32>
    %54 = arith.mulf %52, %53 : vector<8x1xf32>
    %55 = arith.mulf %50, %48 : vector<8x768xf32>
    %cst_40 = arith.constant dense<0.000000e+00> : vector<8xf32>
    %56 = vector.multi_reduction <add>, %55, %cst_40 [1] : vector<8x768xf32> to vector<8xf32>
    %57 = vector.shape_cast %56 : vector<8xf32> to vector<8x1xf32>
    %cst_41 = arith.constant 0.001953125 : f32
    %58 = vector.broadcast %cst_41 : f32 to vector<8x1xf32>
    %59 = arith.mulf %57, %58 : vector<8x1xf32>
    %60 = arith.mulf %54, %54 : vector<8x1xf32>
    %61 = arith.subf %59, %60 : vector<8x1xf32>
    %cst_42 = arith.constant 9.99999974E-6 : f32
    %62 = vector.broadcast %cst_42 : f32 to vector<8x1xf32>
    %63 = arith.addf %61, %62 : vector<8x1xf32>
    %64 = math.rsqrt %63 : vector<8x1xf32>
    %65 = arith.mulf %2, %64 : vector<8x1xf32>
    %66 = arith.mulf %54, %65 : vector<8x1xf32>
    %67 = arith.subf %3, %66 : vector<8x1xf32>
    %68 = vector.broadcast %65 : vector<8x1xf32> to vector<8x768xf32>
    %69 = arith.mulf %48, %68 : vector<8x768xf32>
    %70 = vector.broadcast %67 : vector<8x1xf32> to vector<8x768xf32>
    %71 = arith.addf %69, %70 : vector<8x768xf32>
    %cst_43 = arith.constant 0.000000e+00 : f32
    %72 = vector.broadcast %cst_43 : f32 to vector<8x768xf32>
    %73 = arith.maximumf %71, %72 : vector<8x768xf32>
    %74 = vector.broadcast %0 : vector<1x768xf32> to vector<8x768xf32>
    %75 = arith.mulf %73, %74 : vector<8x768xf32>
    %c19_i32_44 = arith.constant 19 : i32
    %76 = tpu.dynamic_rotate %75 by %c19_i32_44 dim 1 : vector<8x768xf32>, i32 -> vector<8x768xf32>
    %c0_45 = arith.constant 0 : index
    %c0_46 = arith.constant 0 : index
    %c0_47 = arith.constant 0 : index
    %77 = vector.load %arg3[%c0_45, %c0_46, %c0_47] : memref<9x8x8xf32, #tpu.memory_space<vmem>>, vector<1x8x8xf32>
    %78 = vector.shape_cast %77 : vector<1x8x8xf32> to vector<8x8xf32>
    %cst_48 = arith.constant dense<0.000000e+00> : vector<8x768xf32>
    %79 = tpu.matmul %78, %76, %cst_48 {dimension_numbers = #tpu.dot_dimension_numbers<[1], [0], [0], [1], [0, 0, 1, 1], [], []>} : vector<8x8xf32>, vector<8x768xf32>, vector<8x768xf32> -> vector<8x768xf32>
    %c18_i32_49 = arith.constant 18 : i32
    %80 = tpu.dynamic_rotate %75 by %c18_i32_49 dim 1 : vector<8x768xf32>, i32 -> vector<8x768xf32>
    %c1_50 = arith.constant 1 : index
    %c0_51 = arith.constant 0 : index
    %c0_52 = arith.constant 0 : index
    %81 = vector.load %arg3[%c1_50, %c0_51, %c0_52] : memref<9x8x8xf32, #tpu.memory_space<vmem>>, vector<1x8x8xf32>
    %82 = vector.shape_cast %81 : vector<1x8x8xf32> to vector<8x8xf32>
    %cst_53 = arith.constant dense<0.000000e+00> : vector<8x768xf32>
    %83 = tpu.matmul %82, %80, %cst_53 {dimension_numbers = #tpu.dot_dimension_numbers<[1], [0], [0], [1], [0, 0, 1, 1], [], []>} : vector<8x8xf32>, vector<8x768xf32>, vector<8x768xf32> -> vector<8x768xf32>
    %84 = arith.addf %79, %83 : vector<8x768xf32>
    %c17_i32_54 = arith.constant 17 : i32
    %85 = tpu.dynamic_rotate %75 by %c17_i32_54 dim 1 : vector<8x768xf32>, i32 -> vector<8x768xf32>
    %c2_55 = arith.constant 2 : index
    %c0_56 = arith.constant 0 : index
    %c0_57 = arith.constant 0 : index
    %86 = vector.load %arg3[%c2_55, %c0_56, %c0_57] : memref<9x8x8xf32, #tpu.memory_space<vmem>>, vector<1x8x8xf32>
    %87 = vector.shape_cast %86 : vector<1x8x8xf32> to vector<8x8xf32>
    %cst_58 = arith.constant dense<0.000000e+00> : vector<8x768xf32>
    %88 = tpu.matmul %87, %85, %cst_58 {dimension_numbers = #tpu.dot_dimension_numbers<[1], [0], [0], [1], [0, 0, 1, 1], [], []>} : vector<8x8xf32>, vector<8x768xf32>, vector<8x768xf32> -> vector<8x768xf32>
    %89 = arith.addf %84, %88 : vector<8x768xf32>
    %c1_i32_59 = arith.constant 1 : i32
    %90 = tpu.dynamic_rotate %75 by %c1_i32_59 dim 1 : vector<8x768xf32>, i32 -> vector<8x768xf32>
    %c3_60 = arith.constant 3 : index
    %c0_61 = arith.constant 0 : index
    %c0_62 = arith.constant 0 : index
    %91 = vector.load %arg3[%c3_60, %c0_61, %c0_62] : memref<9x8x8xf32, #tpu.memory_space<vmem>>, vector<1x8x8xf32>
    %92 = vector.shape_cast %91 : vector<1x8x8xf32> to vector<8x8xf32>
    %cst_63 = arith.constant dense<0.000000e+00> : vector<8x768xf32>
    %93 = tpu.matmul %92, %90, %cst_63 {dimension_numbers = #tpu.dot_dimension_numbers<[1], [0], [0], [1], [0, 0, 1, 1], [], []>} : vector<8x8xf32>, vector<8x768xf32>, vector<8x768xf32> -> vector<8x768xf32>
    %94 = arith.addf %89, %93 : vector<8x768xf32>
    %c4_64 = arith.constant 4 : index
    %c0_65 = arith.constant 0 : index
    %c0_66 = arith.constant 0 : index
    %95 = vector.load %arg3[%c4_64, %c0_65, %c0_66] : memref<9x8x8xf32, #tpu.memory_space<vmem>>, vector<1x8x8xf32>
    %96 = vector.shape_cast %95 : vector<1x8x8xf32> to vector<8x8xf32>
    %cst_67 = arith.constant dense<0.000000e+00> : vector<8x768xf32>
    %97 = tpu.matmul %96, %75, %cst_67 {dimension_numbers = #tpu.dot_dimension_numbers<[1], [0], [0], [1], [0, 0, 1, 1], [], []>} : vector<8x8xf32>, vector<8x768xf32>, vector<8x768xf32> -> vector<8x768xf32>
    %98 = arith.addf %94, %97 : vector<8x768xf32>
    %c767_i32_68 = arith.constant 767 : i32
    %99 = tpu.dynamic_rotate %75 by %c767_i32_68 dim 1 : vector<8x768xf32>, i32 -> vector<8x768xf32>
    %c5_69 = arith.constant 5 : index
    %c0_70 = arith.constant 0 : index
    %c0_71 = arith.constant 0 : index
    %100 = vector.load %arg3[%c5_69, %c0_70, %c0_71] : memref<9x8x8xf32, #tpu.memory_space<vmem>>, vector<1x8x8xf32>
    %101 = vector.shape_cast %100 : vector<1x8x8xf32> to vector<8x8xf32>
    %cst_72 = arith.constant dense<0.000000e+00> : vector<8x768xf32>
    %102 = tpu.matmul %101, %99, %cst_72 {dimension_numbers = #tpu.dot_dimension_numbers<[1], [0], [0], [1], [0, 0, 1, 1], [], []>} : vector<8x8xf32>, vector<8x768xf32>, vector<8x768xf32> -> vector<8x768xf32>
    %103 = arith.addf %98, %102 : vector<8x768xf32>
    %c751_i32_73 = arith.constant 751 : i32
    %104 = tpu.dynamic_rotate %75 by %c751_i32_73 dim 1 : vector<8x768xf32>, i32 -> vector<8x768xf32>
    %c6_74 = arith.constant 6 : index
    %c0_75 = arith.constant 0 : index
    %c0_76 = arith.constant 0 : index
    %105 = vector.load %arg3[%c6_74, %c0_75, %c0_76] : memref<9x8x8xf32, #tpu.memory_space<vmem>>, vector<1x8x8xf32>
    %106 = vector.shape_cast %105 : vector<1x8x8xf32> to vector<8x8xf32>
    %cst_77 = arith.constant dense<0.000000e+00> : vector<8x768xf32>
    %107 = tpu.matmul %106, %104, %cst_77 {dimension_numbers = #tpu.dot_dimension_numbers<[1], [0], [0], [1], [0, 0, 1, 1], [], []>} : vector<8x8xf32>, vector<8x768xf32>, vector<8x768xf32> -> vector<8x768xf32>
    %108 = arith.addf %103, %107 : vector<8x768xf32>
    %c750_i32_78 = arith.constant 750 : i32
    %109 = tpu.dynamic_rotate %75 by %c750_i32_78 dim 1 : vector<8x768xf32>, i32 -> vector<8x768xf32>
    %c7_79 = arith.constant 7 : index
    %c0_80 = arith.constant 0 : index
    %c0_81 = arith.constant 0 : index
    %110 = vector.load %arg3[%c7_79, %c0_80, %c0_81] : memref<9x8x8xf32, #tpu.memory_space<vmem>>, vector<1x8x8xf32>
    %111 = vector.shape_cast %110 : vector<1x8x8xf32> to vector<8x8xf32>
    %cst_82 = arith.constant dense<0.000000e+00> : vector<8x768xf32>
    %112 = tpu.matmul %111, %109, %cst_82 {dimension_numbers = #tpu.dot_dimension_numbers<[1], [0], [0], [1], [0, 0, 1, 1], [], []>} : vector<8x8xf32>, vector<8x768xf32>, vector<8x768xf32> -> vector<8x768xf32>
    %113 = arith.addf %108, %112 : vector<8x768xf32>
    %c749_i32_83 = arith.constant 749 : i32
    %114 = tpu.dynamic_rotate %75 by %c749_i32_83 dim 1 : vector<8x768xf32>, i32 -> vector<8x768xf32>
    %c8_84 = arith.constant 8 : index
    %c0_85 = arith.constant 0 : index
    %c0_86 = arith.constant 0 : index
    %115 = vector.load %arg3[%c8_84, %c0_85, %c0_86] : memref<9x8x8xf32, #tpu.memory_space<vmem>>, vector<1x8x8xf32>
    %116 = vector.shape_cast %115 : vector<1x8x8xf32> to vector<8x8xf32>
    %cst_87 = arith.constant dense<0.000000e+00> : vector<8x768xf32>
    %117 = tpu.matmul %116, %114, %cst_87 {dimension_numbers = #tpu.dot_dimension_numbers<[1], [0], [0], [1], [0, 0, 1, 1], [], []>} : vector<8x8xf32>, vector<8x768xf32>, vector<8x768xf32> -> vector<8x768xf32>
    %118 = arith.addf %113, %117 : vector<8x768xf32>
    %119 = vector.broadcast %0 : vector<1x768xf32> to vector<8x768xf32>
    %120 = arith.mulf %118, %119 : vector<8x768xf32>
    %cst_88 = arith.constant dense<0.000000e+00> : vector<8xf32>
    %121 = vector.multi_reduction <add>, %120, %cst_88 [1] : vector<8x768xf32> to vector<8xf32>
    %122 = vector.shape_cast %121 : vector<8xf32> to vector<8x1xf32>
    %cst_89 = arith.constant 0.001953125 : f32
    %123 = vector.broadcast %cst_89 : f32 to vector<8x1xf32>
    %124 = arith.mulf %122, %123 : vector<8x1xf32>
    %125 = arith.mulf %120, %118 : vector<8x768xf32>
    %cst_90 = arith.constant dense<0.000000e+00> : vector<8xf32>
    %126 = vector.multi_reduction <add>, %125, %cst_90 [1] : vector<8x768xf32> to vector<8xf32>
    %127 = vector.shape_cast %126 : vector<8xf32> to vector<8x1xf32>
    %cst_91 = arith.constant 0.001953125 : f32
    %128 = vector.broadcast %cst_91 : f32 to vector<8x1xf32>
    %129 = arith.mulf %127, %128 : vector<8x1xf32>
    %130 = arith.mulf %124, %124 : vector<8x1xf32>
    %131 = arith.subf %129, %130 : vector<8x1xf32>
    %cst_92 = arith.constant 9.99999974E-6 : f32
    %132 = vector.broadcast %cst_92 : f32 to vector<8x1xf32>
    %133 = arith.addf %131, %132 : vector<8x1xf32>
    %134 = math.rsqrt %133 : vector<8x1xf32>
    %135 = arith.mulf %4, %134 : vector<8x1xf32>
    %136 = arith.mulf %124, %135 : vector<8x1xf32>
    %137 = arith.subf %5, %136 : vector<8x1xf32>
    %138 = vector.broadcast %135 : vector<8x1xf32> to vector<8x768xf32>
    %139 = arith.mulf %118, %138 : vector<8x768xf32>
    %140 = vector.broadcast %137 : vector<8x1xf32> to vector<8x768xf32>
    %141 = arith.addf %139, %140 : vector<8x768xf32>
    %142 = arith.addf %141, %1 : vector<8x768xf32>
    %cst_93 = arith.constant 0.000000e+00 : f32
    %143 = vector.broadcast %cst_93 : f32 to vector<8x768xf32>
    %144 = arith.maximumf %142, %143 : vector<8x768xf32>
    %c0_94 = arith.constant 0 : index
    %c0_95 = arith.constant 0 : index
    %145 = vector.load %arg5[%c0_94, %c0_95] : memref<8x768xf32, #tpu.memory_space<vmem>>, vector<8x768xf32>
    tpu.vector_store %arg5[%c0_94, %c0_95], %144 {strides = array<i32>} : memref<8x768xf32, #tpu.memory_space<vmem>>, vector<8x768xf32>,
    return
  }
}

</mosaic_0001>

<bundles_post_ra>
// kernel: tpu_custom_call.1
= control target key start
LH: loop header
LB: loop body
LE: loop exit
PB: predicated region body
PF: predicated region fallthrough
CT: control target
= control target key end

     0   :  { %s4749_s22 = smov 18   ;;  %v4750_v4 = vmov 0.0   ;;  %s5479_s0 = inlined_call_operand.vmem [shape: f32[8,768], index: 0, kind: input, shape index: {}]   ;;  %s5480_s1 = inlined_call_operand.vmem [shape: f32[1,768], index: 1, kind: input, shape index: {}]   ;;  %s5481_s2 = inlined_call_operand.vmem [shape: f32[9,8,8], index: 2, kind: input, shape index: {}]   ;;  %s5482_s3 = inlined_call_operand.vmem [shape: f32[9,8,8], index: 3, kind: input, shape index: {}]   ;;  %s5483_s4 = inlined_call_operand.vmem [shape: f32[8,4], index: 4, kind: input, shape index: {}]   ;;  %s5484_s5 = inlined_call_operand.hbm [shape: f32[8,768], index: 5, kind: output, shape index: {}]  }
   0x1   :  { %v4796_v0 = vld [vmem:[%s5479_s0 + $0x28] sm:$0xff]  ;;  %v4801_v1 = vld [vmem:[%s5479_s0] sm:$0xff]  ;;  %v4810_v2 = vld [vmem:[%s5479_s0 + $0x10] sm:$0xff]  ;;  %140 = vmatprep.mubr.f32.mxu0 %v4750_v4  ;;  %2397 = vmatprep.mubr.f32.mxu1 %v4750_v4 }
   0x2   :  { %61 = vrot.lane.b32.xlu1 %v4796_v0, %s4749_s22  ;;  %51 = vrot.lane.b32.xlu0 %v4801_v1, %s4749_s22  ;;  %v4815_v3 = vld [vmem:[%s5479_s0 + $0x8] sm:$0xff] }
   0x3   :  { %10 = vsyncpa [#allocation3], 0  ;;  %v4826_v5 = vld [vmem:[%s5479_s0 + $0x20] sm:$0xff]  ;;  %v4831_v6 = vld [vmem:[%s5479_s0 + $0x18] sm:$0xff]  ;;  %s4751_s6 = smov 19   ;;  %s4752_s7 = smov 17   ;;  %v41_v7 = vlaneseq }
   0x4   :  { %s4753_s8 = smov 1   ;;  %s4754_s9 = smov 127   ;;  %v4531_v14 = vld [vmem:[%s5481_s2 + $0x8] sm:$0xff]  ;;  %vm72_vm1 = vcmask 64512   ;;  %v50_v28 = vld [vmem:[%s5481_s2] sm:$0xff]  ;;  %v4538_v41 = vld [vmem:[%s5481_s2 + $0x10] sm:$0xff] }
   0x5   :  { %s4755_s10 = smov 111   ;;  %s4756_s11 = smov 110   ;;  %v4922_v8 = vand.u32 127, %v41_v7  ;;  %v4542_v54 = vld [vmem:[%s5481_s2 + $0x18] sm:$0xff] }
   0x6   :  { %55 = vrot.lane.b32.xlu1 %v4810_v2, %s4749_s22  ;;  %53 = vrot.lane.b32.xlu0 %v4815_v3, %s4749_s22  ;;  %s4757_s12 = smov 109   ;;  %s4762_s14 = smov [#allocation2]  }
   0x7   :  { %vm63_vm0 = vcmp.lt.s32.totalorder %v4922_v8, 18  ;;  %vm43_vm2 = vcmp.lt.s32.totalorder %v4922_v8, 19  ;;  %vm517_vm3 = vcmp.lt.s32.totalorder %v4922_v8, 17  ;;  %vm760_vm4 = vcmp.lt.s32.totalorder %v4922_v8, 1 }
   0x8   :  { %vm1227_vm5 = vcmp.lt.s32.totalorder %v4922_v8, 127  ;;  %vm1470_vm6 = vcmp.lt.s32.totalorder %v4922_v8, 111  ;;  %vm1713_vm7 = vcmp.lt.s32.totalorder %v4922_v8, 110  ;;  %vm1956_vm8 = vcmp.lt.s32.totalorder %v4922_v8, 109 }
   0xa   :  { %59 = vrot.lane.b32.xlu1 %v4826_v5, %s4749_s22  ;;  %57 = vrot.lane.b32.xlu0 %v4831_v6, %s4749_s22 }
   0xe   :  { %31 = vrot.lane.b32.xlu1 %v4815_v3, %s4751_s6  ;;  %29 = vrot.lane.b32.xlu0 %v4801_v1, %s4751_s6 }
  0x12   :  { %33 = vrot.lane.b32.xlu1 %v4810_v2, %s4751_s6  ;;  %39 = vrot.lane.b32.xlu0 %v4796_v0, %s4751_s6 }
  0x16   :  { %37 = vrot.lane.b32.xlu1 %v4826_v5, %s4751_s6  ;;  %35 = vrot.lane.b32.xlu0 %v4831_v6, %s4751_s6 }
  0x1a   :  { %507 = vrot.lane.b32.xlu1 %v4815_v3, %s4752_s7  ;;  %505 = vrot.lane.b32.xlu0 %v4801_v1, %s4752_s7 }
  0x1e   :  { %509 = vrot.lane.b32.xlu1 %v4810_v2, %s4752_s7  ;;  %515 = vrot.lane.b32.xlu0 %v4796_v0, %s4752_s7 }
  0x22   :  { %513 = vrot.lane.b32.xlu1 %v4826_v5, %s4752_s7  ;;  %511 = vrot.lane.b32.xlu0 %v4831_v6, %s4752_s7 }
  0x26   :  { %750 = vrot.lane.b32.xlu1 %v4815_v3, %s4753_s8  ;;  %748 = vrot.lane.b32.xlu0 %v4801_v1, %s4753_s8 }
  0x2a   :  { %752 = vrot.lane.b32.xlu1 %v4810_v2, %s4753_s8  ;;  %758 = vrot.lane.b32.xlu0 %v4796_v0, %s4753_s8 }
  0x2e   :  { %756 = vrot.lane.b32.xlu1 %v4826_v5, %s4753_s8  ;;  %754 = vrot.lane.b32.xlu0 %v4831_v6, %s4753_s8 }
  0x32   :  { %1219 = vrot.lane.b32.xlu1 %v4810_v2, %s4754_s9  ;;  %1217 = vrot.lane.b32.xlu0 %v4815_v3, %s4754_s9 }
  0x36   :  { %1221 = vrot.lane.b32.xlu1 %v4831_v6, %s4754_s9  ;;  %1215 = vrot.lane.b32.xlu0 %v4801_v1, %s4754_s9 }
  0x3a   :  { %1225 = vrot.lane.b32.xlu1 %v4796_v0, %s4754_s9  ;;  %1223 = vrot.lane.b32.xlu0 %v4826_v5, %s4754_s9 }
  0x3e   :  { %1462 = vrot.lane.b32.xlu1 %v4810_v2, %s4755_s10  ;;  %1460 = vrot.lane.b32.xlu0 %v4815_v3, %s4755_s10 }
  0x42   :  { %1464 = vrot.lane.b32.xlu1 %v4831_v6, %s4755_s10  ;;  %1458 = vrot.lane.b32.xlu0 %v4801_v1, %s4755_s10 }
  0x46   :  { %1468 = vrot.lane.b32.xlu1 %v4796_v0, %s4755_s10  ;;  %1466 = vrot.lane.b32.xlu0 %v4826_v5, %s4755_s10 }
  0x4a   :  { %1705 = vrot.lane.b32.xlu1 %v4810_v2, %s4756_s11  ;;  %1703 = vrot.lane.b32.xlu0 %v4815_v3, %s4756_s11 }
  0x4e   :  { %1707 = vrot.lane.b32.xlu1 %v4831_v6, %s4756_s11  ;;  %1701 = vrot.lane.b32.xlu0 %v4801_v1, %s4756_s11 }
  0x52   :  { %1711 = vrot.lane.b32.xlu1 %v4796_v0, %s4756_s11  ;;  %1709 = vrot.lane.b32.xlu0 %v4826_v5, %s4756_s11 }
  0x56   :  { %1948 = vrot.lane.b32.xlu1 %v4810_v2, %s4757_s12  ;;  %1946 = vrot.lane.b32.xlu0 %v4815_v3, %s4757_s12 }
  0x5a   :  { %1950 = vrot.lane.b32.xlu1 %v4831_v6, %s4757_s12  ;;  %1944 = vrot.lane.b32.xlu0 %v4801_v1, %s4757_s12 }
  0x5e   :  { %1954 = vrot.lane.b32.xlu1 %v4796_v0, %s4757_s12  ;;  %1952 = vrot.lane.b32.xlu0 %v4826_v5, %s4757_s12 }
  0x74   :  { %v62_v9 = vpop.permute.xlu1 %61  ;;  %v52_v10 = vpop.permute.xlu0 %51 }
  0x75   :  { %v69_v15 = vsel %vm63_vm0, %v62_v9, %v52_v10 }
  0x78   :  { %v56_v11 = vpop.permute.xlu1 %55  ;;  %v54_v12 = vpop.permute.xlu0 %53 }
  0x79   :  { %v68_v13 = vsel %vm63_vm0, %v52_v10, %v54_v12  ;;  %v67_v19 = vsel %vm63_vm0, %v54_v12, %v56_v11  ;;  %v4546_v10 = vld [vmem:[%s5481_s2 + $0x20] sm:$0xff] }
  0x7a   :  { %76 = vmatprep.subr.mxu0 %v68_v13 }
  0x7b   :  { %77 = vmatpush1.msra.mxu0 %v69_v15 }
  0x7c   :  { %v60_v16 = vpop.permute.xlu1 %59  ;;  %4532 = vmatmul.mubr.msk.f32.vlgmr.msra.gmra.mrb[0].mxu0 %vm72_vm1, %v4531_v14  ;;  %v58_v17 = vpop.permute.xlu0 %57 }
  0x7d   :  { %v66_v18 = vsel %vm63_vm0, %v56_v11, %v58_v17  ;;  %211 = vmatprep.mubr.f32.mxu0 %v4750_v4  ;;  %v64_v20 = vsel %vm63_vm0, %v60_v16, %v62_v9  ;;  %v65_v23 = vsel %vm63_vm0, %v58_v17, %v60_v16 }
  0x7e   :  { %147 = vmatprep.subr.mxu0 %v66_v18 }
  0x7f   :  { %148 = vmatpush1.msra.mxu0 %v67_v19 }
  0x80   :  { %v32_v21 = vpop.permute.xlu1 %31  ;;  %4533 = vmatmul.mubr.msk.f32.vlgmr.msra.gmra.mrb[2].mxu0 %vm72_vm1, %v4531_v14  ;;  %218 = vmatprep.subr.mxu0 %v64_v20  ;;  %v30_v22 = vpop.permute.xlu0 %29 }
  0x81   :  { %219 = vmatpush1.msra.mxu0 %v65_v23  ;;  %v48_v24 = vsel %vm43_vm2, %v30_v22, %v32_v21  ;;  %282 = vmatprep.mubr.f32.mxu0 %v4750_v4 }
  0x82   :  { %292 = vmatprep.subr.mxu0 %v48_v24 }
  0x84   :  { %v34_v25 = vpop.permute.xlu1 %33  ;;  %4534 = vmatmul.mubr.msk.f32.vlgmr.msra.gmra.mrb[4].mxu0 %vm72_vm1, %v4531_v14  ;;  %v40_v26 = vpop.permute.xlu0 %39 }
  0x85   :  { %v49_v27 = vsel %vm43_vm2, %v40_v26, %v30_v22  ;;  %356 = vmatprep.mubr.f32.mxu0 %v4750_v4  ;;  %v47_v32 = vsel %vm43_vm2, %v32_v21, %v34_v25 }
  0x86   :  { %293 = vmatpush1.msra.mxu0 %v49_v27 }
  0x88   :  { %v38_v29 = vpop.permute.xlu1 %37  ;;  %4535 = vmatmul.mubr.msk.f32.vlgmr.msra.gmra.mrb[0].mxu0 %vm72_vm1, %v50_v28  ;;  %v36_v30 = vpop.permute.xlu0 %35 }
  0x89   :  { %v46_v31 = vsel %vm43_vm2, %v34_v25, %v36_v30  ;;  %427 = vmatprep.mubr.f32.mxu0 %v4750_v4  ;;  %v44_v33 = vsel %vm43_vm2, %v38_v29, %v40_v26  ;;  %v45_v34 = vsel %vm43_vm2, %v36_v30, %v38_v29  ;;  %v4554_v26 = vld [vmem:[%s5481_s2 + $0x30] sm:$0xff] }
  0x8a   :  { %363 = vmatprep.subr.mxu0 %v46_v31 }
  0x8b   :  { %364 = vmatpush1.msra.mxu0 %v47_v32 }
  0x8c   :  { %v508_v35 = vpop.permute.xlu1 %507  ;;  %4536 = vmatmul.mubr.msk.f32.vlgmr.msra.gmra.mrb[2].mxu0 %vm72_vm1, %v50_v28  ;;  %434 = vmatprep.subr.mxu0 %v44_v33  ;;  %v506_v36 = vpop.permute.xlu0 %505 }
  0x8d   :  { %435 = vmatpush1.msra.mxu0 %v45_v34  ;;  %v522_v37 = vsel %vm517_vm3, %v506_v36, %v508_v35  ;;  %498 = vmatprep.mubr.f32.mxu0 %v4750_v4 }
  0x8e   :  { %529 = vmatprep.subr.mxu0 %v522_v37  ;;  %v4558_v37 = vld [vmem:[%s5481_s2 + $0x38] sm:$0xff] }
  0x90   :  { %v510_v38 = vpop.permute.xlu1 %509  ;;  %4537 = vmatmul.mubr.msk.f32.vlgmr.msra.gmra.mrb[4].mxu0 %vm72_vm1, %v50_v28  ;;  %v516_v39 = vpop.permute.xlu0 %515 }
  0x91   :  { %v523_v40 = vsel %vm517_vm3, %v516_v39, %v506_v36  ;;  %593 = vmatprep.mubr.f32.mxu0 %v4750_v4  ;;  %v521_v45 = vsel %vm517_vm3, %v508_v35, %v510_v38 }
  0x92   :  { %530 = vmatpush1.msra.mxu0 %v523_v40 }
  0x94   :  { %v514_v42 = vpop.permute.xlu1 %513  ;;  %4539 = vmatmul.mubr.msk.f32.vlgmr.msra.gmra.mrb[0].mxu0 %vm72_vm1, %v4538_v41  ;;  %v512_v43 = vpop.permute.xlu0 %511 }
  0x95   :  { %v520_v44 = vsel %vm517_vm3, %v510_v38, %v512_v43  ;;  %664 = vmatprep.mubr.f32.mxu0 %v4750_v4  ;;  %v518_v46 = vsel %vm517_vm3, %v514_v42, %v516_v39  ;;  %v519_v47 = vsel %vm517_vm3, %v512_v43, %v514_v42 }
  0x96   :  { %600 = vmatprep.subr.mxu0 %v520_v44 }
  0x97   :  { %601 = vmatpush1.msra.mxu0 %v521_v45 }
  0x98   :  { %v751_v48 = vpop.permute.xlu1 %750  ;;  %4540 = vmatmul.mubr.msk.f32.vlgmr.msra.gmra.mrb[2].mxu0 %vm72_vm1, %v4538_v41  ;;  %671 = vmatprep.subr.mxu0 %v518_v46  ;;  %v749_v49 = vpop.permute.xlu0 %748 }
  0x99   :  { %672 = vmatpush1.msra.mxu0 %v519_v47  ;;  %v765_v50 = vsel %vm760_vm4, %v749_v49, %v751_v48  ;;  %735 = vmatprep.mubr.f32.mxu0 %v4750_v4 }
  0x9a   :  { %772 = vmatprep.subr.mxu0 %v765_v50 }
  0x9c   :  { %v753_v51 = vpop.permute.xlu1 %752  ;;  %4541 = vmatmul.mubr.msk.f32.vlgmr.msra.gmra.mrb[4].mxu0 %vm72_vm1, %v4538_v41  ;;  %v759_v52 = vpop.permute.xlu0 %758 }
  0x9d   :  { %v766_v53 = vsel %vm760_vm4, %v759_v52, %v749_v49  ;;  %836 = vmatprep.mubr.f32.mxu0 %v4750_v4  ;;  %v764_v58 = vsel %vm760_vm4, %v751_v48, %v753_v51  ;;  %v4562_v48 = vld [vmem:[%s5481_s2 + $0x40] sm:$0xff] }
  0x9e   :  { %773 = vmatpush1.msra.mxu0 %v766_v53  ;;  %v2189_v53 = vshrl.u32 %v41_v7, 7 }
  0xa0   :  { %v757_v55 = vpop.permute.xlu1 %756  ;;  %4543 = vmatmul.mubr.msk.f32.vlgmr.msra.gmra.mrb[0].mxu0 %vm72_vm1, %v4542_v54  ;;  %v755_v56 = vpop.permute.xlu0 %754 }
  0xa1   :  { %v763_v57 = vsel %vm760_vm4, %v753_v51, %v755_v56  ;;  %907 = vmatprep.mubr.f32.mxu0 %v4750_v4  ;;  %v761_v59 = vsel %vm760_vm4, %v757_v55, %v759_v52  ;;  %v762_v60 = vsel %vm760_vm4, %v755_v56, %v757_v55  ;;  %v21_v55 = vld [vmem:[%s5480_s1] sm:$0x3f]  ;;  %v2194_v56 = vsub.s32 1, %v2189_v53  ;;  %s4523_s1 = sshll.u32 %s4762_s14, 4  ;;  %s4524_s1 = int_to_ptr.vmem [resolvable:$true] %s4523_s1 }
  0xa2   :  { %843 = vmatprep.subr.mxu0 %v763_v57  ;;  %p4730_p1 = scmp.lt.s32.totalorder %s4524_s1, %s4524_s1 }
  0xa3   :  { %844 = vmatpush1.msra.mxu0 %v764_v58  ;;  %v2198_v58 = vsub.s32 2, %v2189_v53 }
  0xa4   :  { %4544 = vmatmul.mubr.msk.f32.vlgmr.msra.gmra.mrb[2].mxu0 %vm72_vm1, %v4542_v54  ;;  %914 = vmatprep.subr.mxu0 %v761_v59  ;;  %v1220_v61 = vpop.permute.xlu1 %1219  ;;  %v1218_v62 = vpop.permute.xlu0 %1217  ;;  %v5120_v59 = vrot.slane %v21_v55, %v2194_v56 }
  0xa5   :  { %915 = vmatpush1.msra.mxu0 %v762_v60  ;;  %978 = vmatprep.mubr.f32.mxu0 %v4750_v4  ;;  %v2202_v60 = vsub.s32 3, %v2189_v53 }
  0xa6   :  { %996 = vmatprep.subr.mxu0 %v4815_v3 }
  0xa8   :  { %4545 = vmatmul.mubr.msk.f32.vlgmr.msra.gmra.mrb[4].mxu0 %vm72_vm1, %v4542_v54  ;;  %v1222_v63 = vpop.permute.xlu1 %1221  ;;  %v1216_v9 = vpop.permute.xlu0 %1215  ;;  %v2190_v54 = vsub.s32 0, %v2189_v53 }
  0xa9   :  { %997 = vmatpush1.msra.mxu0 %v4801_v1  ;;  %1060 = vmatprep.mubr.f32.mxu0 %v4750_v4  ;;  %v1231_v1 = vsel %vm1227_vm5, %v1218_v62, %v1220_v61  ;;  %v1230_v15 = vsel %vm1227_vm5, %v1220_v61, %v1222_v63 }
  0xaa   :  { %1067 = vmatprep.subr.mxu0 %v4831_v6  ;;  %v5118_v57 = vrot.slane %v21_v55, %v2190_v54 }
  0xac   :  { %4547 = vmatmul.mubr.msk.f32.vlgmr.msra.gmra.mrb[0].mxu0 %vm72_vm1, %v4546_v10  ;;  %v1226_v11 = vpop.permute.xlu1 %1225  ;;  %v1224_v3 = vpop.permute.xlu0 %1223 }
  0xad   :  { %1068 = vmatpush1.msra.mxu0 %v4810_v2  ;;  %1131 = vmatprep.mubr.f32.mxu0 %v4750_v4  ;;  %v1229_v6 = vsel %vm1227_vm5, %v1222_v63, %v1224_v3  ;;  %v1232_v2 = vsel %vm1227_vm5, %v1216_v9, %v1218_v62  ;;  %v1233_v18 = vsel %vm1227_vm5, %v1226_v11, %v1216_v9 }
  0xae   :  { %1138 = vmatprep.subr.mxu0 %v4796_v0  ;;  %v1228_v20 = vsel %vm1227_vm5, %v1224_v3, %v1226_v11  ;;  %v5123_v9 = vrot.slane %v21_v55, %v2198_v58  ;;  %v5126_v11 = vrot.slane %v21_v55, %v2202_v60  ;;  %v2210_v3 = vsub.s32 5, %v2189_v53 }
  0xb0   :  { %4548 = vmatmul.mubr.msk.f32.vlgmr.msra.gmra.mrb[2].mxu0 %vm72_vm1, %v4546_v10  ;;  %v1463_v12 = vpop.permute.xlu1 %1462  ;;  %v1461_v13 = vpop.permute.xlu0 %1460 }
  0xb1   :  { %1139 = vmatpush1.msra.mxu0 %v4826_v5  ;;  %1202 = vmatprep.mubr.f32.mxu0 %v4750_v4  ;;  %v4550_v5 = vld [vmem:[%s5481_s2 + $0x28] sm:$0xff]  ;;  %v1474_v19 = vsel %vm1470_vm6, %v1461_v13, %v1463_v12 }
  0xb2   :  { %1239 = vmatprep.subr.mxu0 %v1231_v1 }
  0xb4   :  { %4549 = vmatmul.mubr.msk.f32.vlgmr.msra.gmra.mrb[4].mxu0 %vm72_vm1, %v4546_v10  ;;  %v1465_v0 = vpop.permute.xlu1 %1464  ;;  %v1459_v14 = vpop.permute.xlu0 %1458  ;;  %v2206_v10 = vsub.s32 4, %v2189_v53 }
  0xb5   :  { %1240 = vmatpush1.msra.mxu0 %v1232_v2  ;;  %1303 = vmatprep.mubr.f32.mxu0 %v4750_v4  ;;  %v1475_v24 = vsel %vm1470_vm6, %v1459_v14, %v1461_v13  ;;  %v1473_v28 = vsel %vm1470_vm6, %v1463_v12, %v1465_v0 }
  0xb6   :  { %1310 = vmatprep.subr.mxu0 %v1229_v6 }
  0xb8   :  { %4551 = vmatmul.mubr.msk.f32.vlgmr.msra.gmra.mrb[0].mxu0 %vm72_vm1, %v4550_v5  ;;  %v1469_v16 = vpop.permute.xlu1 %1468  ;;  %v1467_v17 = vpop.permute.xlu0 %1466 }
  0xb9   :  { %1311 = vmatpush1.msra.mxu0 %v1230_v15  ;;  %1374 = vmatprep.mubr.f32.mxu0 %v4750_v4  ;;  %v1472_v23 = vsel %vm1470_vm6, %v1465_v0, %v1467_v17  ;;  %v1476_v30 = vsel %vm1470_vm6, %v1469_v16, %v1459_v14  ;;  %v1471_v32 = vsel %vm1470_vm6, %v1467_v17, %v1469_v16 }
  0xba   :  { %1381 = vmatprep.subr.mxu0 %v1233_v18  ;;  %v5129_v14 = vrot.slane %v21_v55, %v2206_v10  ;;  %v5132_v16 = vrot.slane %v21_v55, %v2210_v3 }
  0xbc   :  { %4552 = vmatmul.mubr.msk.f32.vlgmr.msra.gmra.mrb[2].mxu0 %vm72_vm1, %v4550_v5  ;;  %v1706_v21 = vpop.permute.xlu1 %1705  ;;  %v1704_v22 = vpop.permute.xlu0 %1703 }
  0xbd   :  { %1382 = vmatpush1.msra.mxu0 %v1228_v20  ;;  %1445 = vmatprep.mubr.f32.mxu0 %v4750_v4  ;;  %v1717_v31 = vsel %vm1713_vm7, %v1704_v22, %v1706_v21 }
  0xbe   :  { %1482 = vmatprep.subr.mxu0 %v1474_v19 }
  0xc0   :  { %4553 = vmatmul.mubr.msk.f32.vlgmr.msra.gmra.mrb[4].mxu0 %vm72_vm1, %v4550_v5  ;;  %v1702_v25 = vpop.permute.xlu0 %1701  ;;  %v1708_v27 = vpop.permute.xlu1 %1707 }
  0xc1   :  { %1483 = vmatpush1.msra.mxu0 %v1475_v24  ;;  %1546 = vmatprep.mubr.f32.mxu0 %v4750_v4  ;;  %v1718_v36 = vsel %vm1713_vm7, %v1702_v25, %v1704_v22  ;;  %v1716_v40 = vsel %vm1713_vm7, %v1706_v21, %v1708_v27 }
  0xc2   :  { %1553 = vmatprep.subr.mxu0 %v1472_v23 }
  0xc4   :  { %4555 = vmatmul.mubr.msk.f32.vlgmr.msra.gmra.mrb[0].mxu0 %vm72_vm1, %v4554_v26  ;;  %v1710_v29 = vpop.permute.xlu0 %1709  ;;  %v1712_v33 = vpop.permute.xlu1 %1711 }
  0xc5   :  { %1554 = vmatpush1.msra.mxu0 %v1473_v28  ;;  %1617 = vmatprep.mubr.f32.mxu0 %v4750_v4  ;;  %v1715_v35 = vsel %vm1713_vm7, %v1708_v27, %v1710_v29  ;;  %v1719_v41 = vsel %vm1713_vm7, %v1712_v33, %v1702_v25  ;;  %v1714_v43 = vsel %vm1713_vm7, %v1710_v29, %v1712_v33  ;;  %v4758_v33 = vmov 0  }
  0xc6   :  { %1624 = vmatprep.subr.mxu0 %v1476_v30  ;;  %4711 = vset.pattern.permute.xlu1 %v4758_v33 }
  0xc8   :  { %4556 = vmatmul.mubr.msk.f32.vlgmr.msra.gmra.mrb[2].mxu0 %vm72_vm1, %v4554_v26  ;;  %v1947_v34 = vpop.permute.xlu0 %1946  ;;  %v1949_v38 = vpop.permute.xlu1 %1948 }
  0xc9   :  { %1625 = vmatpush1.msra.mxu0 %v1471_v32  ;;  %1688 = vmatprep.mubr.f32.mxu0 %v4750_v4  ;;  %v1960_v42 = vsel %vm1956_vm8, %v1947_v34, %v1949_v38 }
  0xca   :  { %1725 = vmatprep.subr.mxu0 %v1717_v31 }
  0xcc   :  { %4557 = vmatmul.mubr.msk.f32.vlgmr.msra.gmra.mrb[4].mxu0 %vm72_vm1, %v4554_v26  ;;  %v1945_v39 = vpop.permute.xlu0 %1944  ;;  %v1951_v44 = vpop.permute.xlu1 %1950 }
  0xcd   :  { %1726 = vmatpush1.msra.mxu0 %v1718_v36  ;;  %1789 = vmatprep.mubr.f32.mxu0 %v4750_v4  ;;  %v1961_v47 = vsel %vm1956_vm8, %v1945_v39, %v1947_v34  ;;  %v1959_v50 = vsel %vm1956_vm8, %v1949_v38, %v1951_v44 }
  0xce   :  { %1796 = vmatprep.subr.mxu0 %v1715_v35 }
  0xd0   :  { %4559 = vmatmul.mubr.msk.f32.vlgmr.msra.gmra.mrb[0].mxu0 %vm72_vm1, %v4558_v37  ;;  %v1953_v45 = vpop.permute.xlu0 %1952  ;;  %v1955_v49 = vpop.permute.xlu1 %1954 }
  0xd1   :  { %1797 = vmatpush1.msra.mxu0 %v1716_v40  ;;  %1860 = vmatprep.mubr.f32.mxu0 %v4750_v4  ;;  %v1958_v46 = vsel %vm1956_vm8, %v1951_v44, %v1953_v45  ;;  %v1962_v51 = vsel %vm1956_vm8, %v1955_v49, %v1945_v39  ;;  %v1957_v52 = vsel %vm1956_vm8, %v1953_v45, %v1955_v49 }
  0xd2   :  { %1867 = vmatprep.subr.mxu0 %v1719_v41  ;;  %v4759_v41 = vmov 1  }
  0xd3   :  { %4712 = vset.pattern.permute.xlu0 %v4759_v41 }
  0xd4   :  { %4560 = vmatmul.mubr.msk.f32.vlgmr.msra.gmra.mrb[2].mxu0 %vm72_vm1, %v4558_v37 }
  0xd5   :  { %1868 = vmatpush1.msra.mxu0 %v1714_v43  ;;  %1931 = vmatprep.mubr.f32.mxu0 %v4750_v4 }
  0xd6   :  { %1968 = vmatprep.subr.mxu0 %v1960_v42  ;;  %v5139_v42 = vld [vmem:[%s5483_s4] sm:$0xff] }
  0xd8   :  { %4561 = vmatmul.mubr.msk.f32.vlgmr.msra.gmra.mrb[4].mxu0 %vm72_vm1, %v4558_v37 }
  0xd9   :  { %1969 = vmatpush1.msra.mxu0 %v1961_v47  ;;  %2032 = vmatprep.mubr.f32.mxu0 %v4750_v4 }
  0xda   :  { %2039 = vmatprep.subr.mxu0 %v1958_v46 }
  0xdc   :  { %4563 = vmatmul.mubr.msk.f32.vlgmr.msra.gmra.mrb[0].mxu0 %vm72_vm1, %v4562_v48 }
  0xdd   :  { %2040 = vmatpush1.msra.mxu0 %v1959_v50  ;;  %2103 = vmatprep.mubr.f32.mxu0 %v4750_v4 }
  0xde   :  { %2110 = vmatprep.subr.mxu0 %v1962_v51 }
  0xe0   :  { %4564 = vmatmul.mubr.msk.f32.vlgmr.msra.gmra.mrb[2].mxu0 %vm72_vm1, %v4562_v48 }
  0xe1   :  { %2111 = vmatpush1.msra.mxu0 %v1957_v52  ;;  %2174 = vmatprep.mubr.f32.mxu0 %v4750_v4 }
  0xe4   :  { %4565 = vmatmul.mubr.msk.f32.vlgmr.msra.gmra.mrb[4].mxu0 %vm72_vm1, %v4562_v48 }
 0x1af   :  { %v2034_v61 = vpop.f32.mrb[0].mxu0 }
 0x1b0   :  { %v2218_v62 = vmul.f32 %v5118_v57, %v2034_v61  ;;  %v2036_v63 = vpop.f32.mrb[1].mxu0 }
 0x1b1   :  { %v2219_v7 = vmul.f32 %v5120_v59, %v2036_v63 }
 0x1b2   :  { %v2232_v1 = vmul.f32 %v2218_v62, %v2034_v61 }
 0x1b3   :  { %v2224_v12 = vadd.f32 %v2219_v7, %v2218_v62  ;;  %v2233_v13 = vmul.f32 %v2219_v7, %v2036_v63  ;;  %v2105_v6 = vpop.f32.mrb[2].mxu0 }
 0x1b4   :  { %v2220_v2 = vmul.f32 %v5123_v9, %v2105_v6  ;;  %v2107_v0 = vpop.f32.mrb[3].mxu0 }
 0x1b5   :  { %v2238_v5 = vadd.f32 %v2233_v13, %v2232_v1  ;;  %v2221_v15 = vmul.f32 %v5126_v11, %v2107_v0 }
 0x1b6   :  { %v2225_v17 = vadd.f32 %v2224_v12, %v2220_v2  ;;  %v2234_v18 = vmul.f32 %v2220_v2, %v2105_v6 }
 0x1b7   :  { %v2235_v19 = vmul.f32 %v2221_v15, %v2107_v0  ;;  %v2176_v20 = vpop.f32.mrb[4].mxu0 }
 0x1b8   :  { %v2239_v21 = vadd.f32 %v2238_v5, %v2234_v18  ;;  %v2222_v22 = vmul.f32 %v5129_v14, %v2176_v20  ;;  %v2178_v23 = vpop.f32.mrb[5].mxu0  ;;  %v2226_v24 = vadd.f32 %v2225_v17, %v2221_v15 }
 0x1b9   :  { %v2223_v25 = vmul.f32 %v5132_v16, %v2178_v23 }
 0x1ba   :  { %v2236_v26 = vmul.f32 %v2222_v22, %v2176_v20  ;;  %v2227_v27 = vadd.f32 %v2226_v24, %v2222_v22  ;;  %v2240_v28 = vadd.f32 %v2239_v21, %v2235_v19 }
 0x1bb   :  { %v2237_v29 = vmul.f32 %v2223_v25, %v2178_v23 }
 0x1bc   :  { %v2228_v30 = vadd.f32 %v2227_v27, %v2223_v25  ;;  %v2241_v31 = vadd.f32 %v2240_v28, %v2236_v26 }
 0x1be   :  { %2229 = vadd.xlane.f32.xlu0 %v2228_v30  ;;  %v2242_v32 = vadd.f32 %v2241_v31, %v2237_v29 }
 0x1c0   :  { %2243 = vadd.xlane.f32.xlu1 %v2242_v32 }
 0x24b   :  { %v2230_v34 = vpop.xlane.xlu0 %2229 }
 0x24c   :  { %v2231_v35 = vmul.f32 0.001953125, %v2230_v34 }
 0x24d   :  { %v2244_v36 = vpop.xlane.xlu1 %2243 }
 0x24e   :  { %v2246_v37 = vmul.f32 %v2231_v35, %v2231_v35  ;;  %v2245_v38 = vmul.f32 0.001953125, %v2244_v36  ;;  %v2309_v36 = vld [vmem:[%s5482_s3] sm:$0xff] }
 0x250   :  { %v2247_v39 = vsub.f32 %v2245_v38, %v2246_v37 }
 0x252   :  { %v2248_v40 = vadd.f32 1e-05, %v2247_v39 }
 0x254   :  { %4715 = vrsqrt.f32 %v2248_v40 }
 0x25e   :  { %v4716_v43 = vpop.eup %4715 }
 0x25f   :  { %v2250_v44 = vmul.f32 %v4716_v43, %v5139_v42 }
 0x261   :  { %2259 = vperm.xlu1 %4711, %v2250_v44   ;;  %v2251_v45 = vmul.f32 %v2250_v44, %v2231_v35 }
 0x263   :  { %2253 = vrot.lane.b32.xlu0 %v2251_v45, %s4753_s8 }
 0x2d5   :  { %v2254_v46 = vpop.permute.xlu0 %2253 }
 0x2d6   :  { %v2256_v47 = vsub.f32 %v5139_v42, %v2254_v46 }
 0x2d8   :  { %2270 = vperm.xlu0 %4712, %v2256_v47  }
 0x2e0   :  { %v2260_v48 = vpop.permute.xlu1 %2259 }
 0x2e1   :  { %v2262_v49 = vmul.f32 %v2260_v48, %v2034_v61  ;;  %v2263_v50 = vmul.f32 %v2260_v48, %v2036_v63  ;;  %v2265_v51 = vmul.f32 %v2260_v48, %v2107_v0  ;;  %v2267_v52 = vmul.f32 %v2260_v48, %v2178_v23  ;;  %v4566_v23 = vld [vmem:[%s5482_s3 + $0x8] sm:$0xff] }
 0x2e2   :  { %v2264_v60 = vmul.f32 %v2260_v48, %v2105_v6  ;;  %v2266_v61 = vmul.f32 %v2260_v48, %v2176_v20 }
 0x357   :  { %v2271_v53 = vpop.permute.xlu0 %2270 }
 0x358   :  { %v2273_v54 = vadd.f32 %v2271_v53, %v2262_v49  ;;  %v2274_v55 = vadd.f32 %v2271_v53, %v2263_v50  ;;  %v2276_v56 = vadd.f32 %v2271_v53, %v2265_v51  ;;  %v2278_v58 = vadd.f32 %v2271_v53, %v2267_v52  ;;  %v4573_v50 = vld [vmem:[%s5482_s3 + $0x10] sm:$0xff] }
 0x359   :  { %v2275_v7 = vadd.f32 %v2271_v53, %v2264_v60  ;;  %v2277_v63 = vadd.f32 %v2271_v53, %v2266_v61 }
 0x35a   :  { %v2279_v62 = vmax.f32 %v2273_v54, 0.0  ;;  %v2284_v10 = vmax.f32 %v2278_v58, 0.0  ;;  %v2280_v3 = vmax.f32 %v2274_v55, 0.0  ;;  %v2282_v12 = vmax.f32 %v2276_v56, 0.0 }
 0x35b   :  { %v2281_v6 = vmax.f32 %v2275_v7, 0.0  ;;  %v2283_v5 = vmax.f32 %v2277_v63, 0.0 }
 0x35c   :  { %v5145_v1 = vmul.f32 %v2279_v62, %v5118_v57  ;;  %v5148_v13 = vmul.f32 %v2284_v10, %v5132_v16  ;;  %v5155_v2 = vmul.f32 %v2280_v3, %v5120_v59  ;;  %v5158_v0 = vmul.f32 %v2282_v12, %v5126_v11  ;;  %v4577_v12 = vld [vmem:[%s5482_s3 + $0x18] sm:$0xff] }
 0x35d   :  { %v5165_v15 = vmul.f32 %v2281_v6, %v5123_v9  ;;  %v5172_v17 = vmul.f32 %v2283_v5, %v5129_v14 }
 0x35e   :  { %2310 = vrot.lane.b32.xlu1 %v5145_v1, %s4749_s22  ;;  %2320 = vrot.lane.b32.xlu0 %v5148_v13, %s4749_s22 }
 0x362   :  { %2312 = vrot.lane.b32.xlu1 %v5155_v2, %s4749_s22  ;;  %2316 = vrot.lane.b32.xlu0 %v5158_v0, %s4749_s22 }
 0x366   :  { %2314 = vrot.lane.b32.xlu1 %v5165_v15, %s4749_s22  ;;  %2291 = vrot.lane.b32.xlu0 %v5145_v1, %s4751_s6 }
 0x36a   :  { %2318 = vrot.lane.b32.xlu1 %v5172_v17, %s4749_s22  ;;  %2301 = vrot.lane.b32.xlu0 %v5148_v13, %s4751_s6 }
 0x36e   :  { %2293 = vrot.lane.b32.xlu1 %v5155_v2, %s4751_s6  ;;  %2297 = vrot.lane.b32.xlu0 %v5158_v0, %s4751_s6 }
 0x372   :  { %2295 = vrot.lane.b32.xlu1 %v5165_v15, %s4751_s6  ;;  %2762 = vrot.lane.b32.xlu0 %v5145_v1, %s4752_s7 }
 0x376   :  { %2299 = vrot.lane.b32.xlu1 %v5172_v17, %s4751_s6  ;;  %2772 = vrot.lane.b32.xlu0 %v5148_v13, %s4752_s7 }
 0x37a   :  { %2764 = vrot.lane.b32.xlu1 %v5155_v2, %s4752_s7  ;;  %2768 = vrot.lane.b32.xlu0 %v5158_v0, %s4752_s7 }
 0x37e   :  { %2766 = vrot.lane.b32.xlu1 %v5165_v15, %s4752_s7  ;;  %3004 = vrot.lane.b32.xlu0 %v5145_v1, %s4753_s8 }
 0x382   :  { %2770 = vrot.lane.b32.xlu1 %v5172_v17, %s4752_s7  ;;  %3014 = vrot.lane.b32.xlu0 %v5148_v13, %s4753_s8  ;;  %s4725_s7 = scalar_lea.vmem %s4524_s1, 768 }
 0x383   :  { %p4726_p0 = scmp.ne.s32.totalorder %s4524_s1, %s4725_s7  ;;  %p4731_p2 = scmp.lt.s32.totalorder %s4725_s7, %s4725_s7 }
 0x385   :  { %p4732_p3 = por %p4731_p2, %p4730_p1 }
 0x386   :  { %3006 = vrot.lane.b32.xlu1 %v5155_v2, %s4753_s8  ;;  %3010 = vrot.lane.b32.xlu0 %v5158_v0, %s4753_s8 }
 0x387   :  { %p4733_p4 = pnand %p4732_p3, %p4726_p0 }
 0x38a   :  { %3008 = vrot.lane.b32.xlu1 %v5165_v15, %s4753_s8  ;;  %3472 = vrot.lane.b32.xlu0 %v5155_v2, %s4754_s9 }
 0x38e   :  { %3012 = vrot.lane.b32.xlu1 %v5172_v17, %s4753_s8  ;;  %3470 = vrot.lane.b32.xlu0 %v5145_v1, %s4754_s9 }
 0x392   :  { %3474 = vrot.lane.b32.xlu1 %v5165_v15, %s4754_s9  ;;  %3478 = vrot.lane.b32.xlu0 %v5172_v17, %s4754_s9 }
 0x396   :  { %3476 = vrot.lane.b32.xlu1 %v5158_v0, %s4754_s9  ;;  %3714 = vrot.lane.b32.xlu0 %v5155_v2, %s4755_s10 }
 0x39a   :  { %3480 = vrot.lane.b32.xlu1 %v5148_v13, %s4754_s9  ;;  %3712 = vrot.lane.b32.xlu0 %v5145_v1, %s4755_s10 }
 0x39e   :  { %3716 = vrot.lane.b32.xlu1 %v5165_v15, %s4755_s10  ;;  %3720 = vrot.lane.b32.xlu0 %v5172_v17, %s4755_s10 }
 0x3a2   :  { %3718 = vrot.lane.b32.xlu1 %v5158_v0, %s4755_s10  ;;  %3956 = vrot.lane.b32.xlu0 %v5155_v2, %s4756_s11 }
 0x3a6   :  { %3722 = vrot.lane.b32.xlu1 %v5148_v13, %s4755_s10  ;;  %3954 = vrot.lane.b32.xlu0 %v5145_v1, %s4756_s11 }
 0x3aa   :  { %3958 = vrot.lane.b32.xlu1 %v5165_v15, %s4756_s11  ;;  %3962 = vrot.lane.b32.xlu0 %v5172_v17, %s4756_s11 }
 0x3ae   :  { %3960 = vrot.lane.b32.xlu1 %v5158_v0, %s4756_s11  ;;  %4198 = vrot.lane.b32.xlu0 %v5155_v2, %s4757_s12 }
 0x3b2   :  { %3964 = vrot.lane.b32.xlu1 %v5148_v13, %s4756_s11  ;;  %4196 = vrot.lane.b32.xlu0 %v5145_v1, %s4757_s12 }
 0x3b6   :  { %4200 = vrot.lane.b32.xlu1 %v5165_v15, %s4757_s12  ;;  %4204 = vrot.lane.b32.xlu0 %v5172_v17, %s4757_s12 }
 0x3ba   :  { %4202 = vrot.lane.b32.xlu1 %v5158_v0, %s4757_s12 }
 0x3be   :  { %4206 = vrot.lane.b32.xlu1 %v5148_v13, %s4757_s12 }
 0x3d0   :  { %v2311_v18 = vpop.permute.xlu1 %2310  ;;  %v2321_v19 = vpop.permute.xlu0 %2320 }
 0x3d1   :  { %v2327_v24 = vsel %vm63_vm0, %v2321_v19, %v2311_v18 }
 0x3d4   :  { %v2313_v20 = vpop.permute.xlu1 %2312  ;;  %v2317_v21 = vpop.permute.xlu0 %2316 }
 0x3d5   :  { %v2326_v22 = vsel %vm63_vm0, %v2311_v18, %v2313_v20 }
 0x3d6   :  { %2333 = vmatprep.subr.mxu1 %v2326_v22 }
 0x3d7   :  { %2334 = vmatpush1.msra.mxu1 %v2327_v24 }
 0x3d8   :  { %4567 = vmatmul.mubr.msk.f32.vlgmr.msra.gmra.mrb[0].mxu1 %vm72_vm1, %v4566_v23  ;;  %v2315_v25 = vpop.permute.xlu1 %2314  ;;  %v2292_v26 = vpop.permute.xlu0 %2291 }
 0x3d9   :  { %v2325_v27 = vsel %vm63_vm0, %v2313_v20, %v2315_v25  ;;  %v2324_v28 = vsel %vm63_vm0, %v2315_v25, %v2317_v21  ;;  %2468 = vmatprep.mubr.f32.mxu1 %v4750_v4  ;;  %v4581_v25 = vld [vmem:[%s5482_s3 + $0x20] sm:$0xff] }
 0x3da   :  { %2404 = vmatprep.subr.mxu1 %v2324_v28 }
 0x3db   :  { %2405 = vmatpush1.msra.mxu1 %v2325_v27 }
 0x3dc   :  { %4568 = vmatmul.mubr.msk.f32.vlgmr.msra.gmra.mrb[2].mxu1 %vm72_vm1, %v4566_v23  ;;  %v2319_v29 = vpop.permute.xlu1 %2318  ;;  %v2302_v30 = vpop.permute.xlu0 %2301 }
 0x3dd   :  { %v2323_v31 = vsel %vm63_vm0, %v2317_v21, %v2319_v29  ;;  %v2322_v32 = vsel %vm63_vm0, %v2319_v29, %v2321_v19  ;;  %2539 = vmatprep.mubr.f32.mxu1 %v4750_v4  ;;  %v2308_v37 = vsel %vm43_vm2, %v2302_v30, %v2292_v26 }
 0x3de   :  { %2475 = vmatprep.subr.mxu1 %v2322_v32 }
 0x3df   :  { %2476 = vmatpush1.msra.mxu1 %v2323_v31 }
 0x3e0   :  { %4569 = vmatmul.mubr.msk.f32.vlgmr.msra.gmra.mrb[4].mxu1 %vm72_vm1, %v4566_v23  ;;  %v2294_v33 = vpop.permute.xlu1 %2293  ;;  %v2298_v34 = vpop.permute.xlu0 %2297 }
 0x3e1   :  { %v2307_v35 = vsel %vm43_vm2, %v2292_v26, %v2294_v33  ;;  %2613 = vmatprep.mubr.f32.mxu1 %v4750_v4 }
 0x3e2   :  { %2549 = vmatprep.subr.mxu1 %v2307_v35 }
 0x3e3   :  { %2550 = vmatpush1.msra.mxu1 %v2308_v37 }
 0x3e4   :  { %4570 = vmatmul.mubr.msk.f32.vlgmr.msra.gmra.mrb[0].mxu1 %vm72_vm1, %v2309_v36  ;;  %v2296_v38 = vpop.permute.xlu1 %2295  ;;  %v2763_v39 = vpop.permute.xlu0 %2762 }
 0x3e5   :  { %v2306_v40 = vsel %vm43_vm2, %v2294_v33, %v2296_v38  ;;  %v2305_v41 = vsel %vm43_vm2, %v2296_v38, %v2298_v34  ;;  %2684 = vmatprep.mubr.f32.mxu1 %v4750_v4 }
 0x3e6   :  { %2620 = vmatprep.subr.mxu1 %v2305_v41  ;;  %v4589_v41 = vld [vmem:[%s5482_s3 + $0x30] sm:$0xff] }
 0x3e7   :  { %2621 = vmatpush1.msra.mxu1 %v2306_v40 }
 0x3e8   :  { %4571 = vmatmul.mubr.msk.f32.vlgmr.msra.gmra.mrb[2].mxu1 %vm72_vm1, %v2309_v36  ;;  %v2300_v43 = vpop.permute.xlu1 %2299  ;;  %v2773_v44 = vpop.permute.xlu0 %2772 }
 0x3e9   :  { %v2304_v45 = vsel %vm43_vm2, %v2298_v34, %v2300_v43  ;;  %v2303_v46 = vsel %vm43_vm2, %v2300_v43, %v2302_v30  ;;  %2755 = vmatprep.mubr.f32.mxu1 %v4750_v4  ;;  %v2779_v51 = vsel %vm517_vm3, %v2773_v44, %v2763_v39 }
 0x3ea   :  { %2691 = vmatprep.subr.mxu1 %v2303_v46 }
 0x3eb   :  { %2692 = vmatpush1.msra.mxu1 %v2304_v45 }
 0x3ec   :  { %4572 = vmatmul.mubr.msk.f32.vlgmr.msra.gmra.mrb[4].mxu1 %vm72_vm1, %v2309_v36  ;;  %v2765_v47 = vpop.permute.xlu1 %2764  ;;  %v2769_v48 = vpop.permute.xlu0 %2768 }
 0x3ed   :  { %v2778_v49 = vsel %vm517_vm3, %v2763_v39, %v2765_v47  ;;  %2849 = vmatprep.mubr.f32.mxu1 %v4750_v4 }
 0x3ee   :  { %2785 = vmatprep.subr.mxu1 %v2778_v49 }
 0x3ef   :  { %2786 = vmatpush1.msra.mxu1 %v2779_v51 }
 0x3f0   :  { %4574 = vmatmul.mubr.msk.f32.vlgmr.msra.gmra.mrb[0].mxu1 %vm72_vm1, %v4573_v50  ;;  %v2767_v52 = vpop.permute.xlu1 %2766  ;;  %v3005_v53 = vpop.permute.xlu0 %3004 }
 0x3f1   :  { %v2777_v54 = vsel %vm517_vm3, %v2765_v47, %v2767_v52  ;;  %v2776_v55 = vsel %vm517_vm3, %v2767_v52, %v2769_v48  ;;  %2920 = vmatprep.mubr.f32.mxu1 %v4750_v4 }
 0x3f2   :  { %2856 = vmatprep.subr.mxu1 %v2776_v55 }
 0x3f3   :  { %2857 = vmatpush1.msra.mxu1 %v2777_v54 }
 0x3f4   :  { %4575 = vmatmul.mubr.msk.f32.vlgmr.msra.gmra.mrb[2].mxu1 %vm72_vm1, %v4573_v50  ;;  %v2771_v56 = vpop.permute.xlu1 %2770  ;;  %v3015_v58 = vpop.permute.xlu0 %3014 }
 0x3f5   :  { %v2775_v60 = vsel %vm517_vm3, %v2769_v48, %v2771_v56  ;;  %v2774_v62 = vsel %vm517_vm3, %v2771_v56, %v2773_v44  ;;  %2991 = vmatprep.mubr.f32.mxu1 %v4750_v4  ;;  %v3021_v61 = vsel %vm760_vm4, %v3015_v58, %v3005_v53 }
 0x3f6   :  { %2927 = vmatprep.subr.mxu1 %v2774_v62 }
 0x3f7   :  { %2928 = vmatpush1.msra.mxu1 %v2775_v60 }
 0x3f8   :  { %4576 = vmatmul.mubr.msk.f32.vlgmr.msra.gmra.mrb[4].mxu1 %vm72_vm1, %v4573_v50  ;;  %v3007_v10 = vpop.permute.xlu1 %3006  ;;  %v3011_v7 = vpop.permute.xlu0 %3010 }
 0x3f9   :  { %v3020_v3 = vsel %vm760_vm4, %v3005_v53, %v3007_v10  ;;  %3091 = vmatprep.mubr.f32.mxu1 %v4750_v4  ;;  %v4593_v53 = vld [vmem:[%s5482_s3 + $0x38] sm:$0xff] }
 0x3fa   :  { %3027 = vmatprep.subr.mxu1 %v3020_v3 }
 0x3fb   :  { %3028 = vmatpush1.msra.mxu1 %v3021_v61  ;;  %v4597_v61 = vld [vmem:[%s5482_s3 + $0x40] sm:$0xff] }
 0x3fc   :  { %4578 = vmatmul.mubr.msk.f32.vlgmr.msra.gmra.mrb[0].mxu1 %vm72_vm1, %v4577_v12  ;;  %v3009_v63 = vpop.permute.xlu1 %3008  ;;  %v3473_v6 = vpop.permute.xlu0 %3472 }
 0x3fd   :  { %v3019_v5 = vsel %vm760_vm4, %v3007_v10, %v3009_v63  ;;  %v3018_v18 = vsel %vm760_vm4, %v3009_v63, %v3011_v7  ;;  %3162 = vmatprep.mubr.f32.mxu1 %v4750_v4 }
 0x3fe   :  { %3098 = vmatprep.subr.mxu1 %v3018_v18 }
 0x3ff   :  { %3099 = vmatpush1.msra.mxu1 %v3019_v5 }
 0x400   :  { %4579 = vmatmul.mubr.msk.f32.vlgmr.msra.gmra.mrb[2].mxu1 %vm72_vm1, %v4577_v12  ;;  %v3013_v19 = vpop.permute.xlu1 %3012  ;;  %v3471_v20 = vpop.permute.xlu0 %3470 }
 0x401   :  { %v3017_v21 = vsel %vm760_vm4, %v3011_v7, %v3013_v19  ;;  %v3016_v22 = vsel %vm760_vm4, %v3013_v19, %v3015_v58  ;;  %3233 = vmatprep.mubr.f32.mxu1 %v4750_v4 }
 0x402   :  { %3169 = vmatprep.subr.mxu1 %v3016_v22 }
 0x403   :  { %3170 = vmatpush1.msra.mxu1 %v3017_v21 }
 0x404   :  { %4580 = vmatmul.mubr.msk.f32.vlgmr.msra.gmra.mrb[4].mxu1 %vm72_vm1, %v4577_v12  ;;  %3251 = vmatprep.subr.mxu1 %v5155_v2  ;;  %v3475_v23 = vpop.permute.xlu1 %3474  ;;  %v3479_v24 = vpop.permute.xlu0 %3478 }
 0x405   :  { %3252 = vmatpush1.msra.mxu1 %v5145_v1  ;;  %3315 = vmatprep.mubr.f32.mxu1 %v4750_v4  ;;  %v3485_v28 = vsel %vm1227_vm5, %v3473_v6, %v3475_v23 }
 0x406   :  { %3322 = vmatprep.subr.mxu1 %v5158_v0  ;;  %v3486_v0 = vsel %vm1227_vm5, %v3471_v20, %v3473_v6 }
 0x408   :  { %4582 = vmatmul.mubr.msk.f32.vlgmr.msra.gmra.mrb[0].mxu1 %vm72_vm1, %v4581_v25  ;;  %v3477_v26 = vpop.permute.xlu1 %3476  ;;  %v3715_v27 = vpop.permute.xlu0 %3714 }
 0x409   :  { %3323 = vmatpush1.msra.mxu1 %v5165_v15  ;;  %3386 = vmatprep.mubr.f32.mxu1 %v4750_v4  ;;  %v3484_v30 = vsel %vm1227_vm5, %v3475_v23, %v3477_v26 }
 0x40a   :  { %3393 = vmatprep.subr.mxu1 %v5148_v13  ;;  %v3483_v13 = vsel %vm1227_vm5, %v3477_v26, %v3479_v24 }
 0x40c   :  { %4583 = vmatmul.mubr.msk.f32.vlgmr.msra.gmra.mrb[2].mxu1 %vm72_vm1, %v4581_v25  ;;  %v3481_v1 = vpop.permute.xlu1 %3480  ;;  %v3713_v2 = vpop.permute.xlu0 %3712 }
 0x40d   :  { %3394 = vmatpush1.msra.mxu1 %v5172_v17  ;;  %3457 = vmatprep.mubr.f32.mxu1 %v4750_v4  ;;  %v4585_v17 = vld [vmem:[%s5482_s3 + $0x28] sm:$0xff]  ;;  %v3487_v32 = vsel %vm1227_vm5, %v3481_v1, %v3471_v20  ;;  %v3482_v34 = vsel %vm1227_vm5, %v3479_v24, %v3481_v1  ;;  %v3728_v37 = vsel %vm1470_vm6, %v3713_v2, %v3715_v27 }
 0x40e   :  { %3493 = vmatprep.subr.mxu1 %v3485_v28 }
 0x410   :  { %4584 = vmatmul.mubr.msk.f32.vlgmr.msra.gmra.mrb[4].mxu1 %vm72_vm1, %v4581_v25  ;;  %v3717_v15 = vpop.permute.xlu1 %3716  ;;  %v3721_v29 = vpop.permute.xlu0 %3720 }
 0x411   :  { %3494 = vmatpush1.msra.mxu1 %v3486_v0  ;;  %3557 = vmatprep.mubr.f32.mxu1 %v4750_v4  ;;  %v3727_v36 = vsel %vm1470_vm6, %v3715_v27, %v3717_v15 }
 0x412   :  { %3564 = vmatprep.subr.mxu1 %v3483_v13 }
 0x414   :  { %4586 = vmatmul.mubr.msk.f32.vlgmr.msra.gmra.mrb[0].mxu1 %vm72_vm1, %v4585_v17  ;;  %v3719_v31 = vpop.permute.xlu1 %3718  ;;  %v3957_v33 = vpop.permute.xlu0 %3956 }
 0x415   :  { %3565 = vmatpush1.msra.mxu1 %v3484_v30  ;;  %3628 = vmatprep.mubr.f32.mxu1 %v4750_v4  ;;  %v3725_v40 = vsel %vm1470_vm6, %v3719_v31, %v3721_v29  ;;  %v3726_v43 = vsel %vm1470_vm6, %v3717_v15, %v3719_v31 }
 0x416   :  { %3635 = vmatprep.subr.mxu1 %v3487_v32 }
 0x418   :  { %4587 = vmatmul.mubr.msk.f32.vlgmr.msra.gmra.mrb[2].mxu1 %vm72_vm1, %v4585_v17  ;;  %v3723_v35 = vpop.permute.xlu1 %3722  ;;  %v3955_v38 = vpop.permute.xlu0 %3954 }
 0x419   :  { %3636 = vmatpush1.msra.mxu1 %v3482_v34  ;;  %3699 = vmatprep.mubr.f32.mxu1 %v4750_v4  ;;  %v3729_v45 = vsel %vm1470_vm6, %v3723_v35, %v3713_v2  ;;  %v3724_v47 = vsel %vm1470_vm6, %v3721_v29, %v3723_v35  ;;  %v3970_v50 = vsel %vm1713_vm7, %v3955_v38, %v3957_v33 }
 0x41a   :  { %3735 = vmatprep.subr.mxu1 %v3727_v36 }
 0x41c   :  { %4588 = vmatmul.mubr.msk.f32.vlgmr.msra.gmra.mrb[4].mxu1 %vm72_vm1, %v4585_v17  ;;  %v3959_v39 = vpop.permute.xlu1 %3958  ;;  %v3963_v46 = vpop.permute.xlu0 %3962 }
 0x41d   :  { %3736 = vmatpush1.msra.mxu1 %v3728_v37  ;;  %3799 = vmatprep.mubr.f32.mxu1 %v4750_v4  ;;  %v3969_v49 = vsel %vm1713_vm7, %v3957_v33, %v3959_v39 }
 0x41e   :  { %3806 = vmatprep.subr.mxu1 %v3725_v40 }
 0x420   :  { %4590 = vmatmul.mubr.msk.f32.vlgmr.msra.gmra.mrb[0].mxu1 %vm72_vm1, %v4589_v41  ;;  %v3961_v44 = vpop.permute.xlu1 %3960  ;;  %v4199_v51 = vpop.permute.xlu0 %4198 }
 0x421   :  { %3807 = vmatpush1.msra.mxu1 %v3726_v43  ;;  %3870 = vmatprep.mubr.f32.mxu1 %v4750_v4  ;;  %v3967_v52 = vsel %vm1713_vm7, %v3961_v44, %v3963_v46  ;;  %v3968_v55 = vsel %vm1713_vm7, %v3959_v39, %v3961_v44 }
 0x422   :  { %3877 = vmatprep.subr.mxu1 %v3729_v45 }
 0x424   :  { %4591 = vmatmul.mubr.msk.f32.vlgmr.msra.gmra.mrb[2].mxu1 %vm72_vm1, %v4589_v41  ;;  %v3965_v48 = vpop.permute.xlu1 %3964  ;;  %v4197_v58 = vpop.permute.xlu0 %4196 }
 0x425   :  { %3878 = vmatpush1.msra.mxu1 %v3724_v47  ;;  %3941 = vmatprep.mubr.f32.mxu1 %v4750_v4  ;;  %v3971_v56 = vsel %vm1713_vm7, %v3965_v48, %v3955_v38  ;;  %v3966_v60 = vsel %vm1713_vm7, %v3963_v46, %v3965_v48  ;;  %v4212_v7 = vsel %vm1956_vm8, %v4197_v58, %v4199_v51 }
 0x426   :  { %3977 = vmatprep.subr.mxu1 %v3969_v49 }
 0x428   :  { %4592 = vmatmul.mubr.msk.f32.vlgmr.msra.gmra.mrb[4].mxu1 %vm72_vm1, %v4589_v41  ;;  %v4201_v54 = vpop.permute.xlu1 %4200  ;;  %v4205_v3 = vpop.permute.xlu0 %4204 }
 0x429   :  { %3978 = vmatpush1.msra.mxu1 %v3970_v50  ;;  %4041 = vmatprep.mubr.f32.mxu1 %v4750_v4  ;;  %v4211_v10 = vsel %vm1956_vm8, %v4199_v51, %v4201_v54 }
 0x42a   :  { %4048 = vmatprep.subr.mxu1 %v3967_v52 }
 0x42c   :  { %4594 = vmatmul.mubr.msk.f32.vlgmr.msra.gmra.mrb[0].mxu1 %vm72_vm1, %v4593_v53  ;;  %v4203_v62 = vpop.permute.xlu1 %4202 }
 0x42d   :  { %4049 = vmatpush1.msra.mxu1 %v3968_v55  ;;  %4112 = vmatprep.mubr.f32.mxu1 %v4750_v4  ;;  %v4209_v12 = vsel %vm1956_vm8, %v4203_v62, %v4205_v3  ;;  %v4210_v6 = vsel %vm1956_vm8, %v4201_v54, %v4203_v62 }
 0x42e   :  { %4119 = vmatprep.subr.mxu1 %v3971_v56 }
 0x430   :  { %4595 = vmatmul.mubr.msk.f32.vlgmr.msra.gmra.mrb[2].mxu1 %vm72_vm1, %v4593_v53  ;;  %v4207_v63 = vpop.permute.xlu1 %4206 }
 0x431   :  { %4120 = vmatpush1.msra.mxu1 %v3966_v60  ;;  %4183 = vmatprep.mubr.f32.mxu1 %v4750_v4  ;;  %v4213_v5 = vsel %vm1956_vm8, %v4207_v63, %v4197_v58  ;;  %v4208_v18 = vsel %vm1956_vm8, %v4205_v3, %v4207_v63  ;;  %v4719_v3 = vld [vmem:[%s5479_s0] sm:$0xff]  ;;  %v4721_v63 = vld [vmem:[%s5479_s0 + $0x10] sm:$0xff] }
 0x432   :  { %4219 = vmatprep.subr.mxu1 %v4211_v10 }
 0x434   :  { %4596 = vmatmul.mubr.msk.f32.vlgmr.msra.gmra.mrb[4].mxu1 %vm72_vm1, %v4593_v53 }
 0x435   :  { %4220 = vmatpush1.msra.mxu1 %v4212_v7  ;;  %4283 = vmatprep.mubr.f32.mxu1 %v4750_v4 }
 0x436   :  { %4290 = vmatprep.subr.mxu1 %v4209_v12  ;;  %v4720_v12 = vld [vmem:[%s5479_s0 + $0x8] sm:$0xff] }
 0x438   :  { %4598 = vmatmul.mubr.msk.f32.vlgmr.msra.gmra.mrb[0].mxu1 %vm72_vm1, %v4597_v61 }
 0x439   :  { %4291 = vmatpush1.msra.mxu1 %v4210_v6  ;;  %4354 = vmatprep.mubr.f32.mxu1 %v4750_v4 }
 0x43a   :  { %4361 = vmatprep.subr.mxu1 %v4213_v5  ;;  %v4722_v5 = vld [vmem:[%s5479_s0 + $0x18] sm:$0xff] }
 0x43c   :  { %4599 = vmatmul.mubr.msk.f32.vlgmr.msra.gmra.mrb[2].mxu1 %vm72_vm1, %v4597_v61 }
 0x43d   :  { %4362 = vmatpush1.msra.mxu1 %v4208_v18  ;;  %4425 = vmatprep.mubr.f32.mxu1 %v4750_v4 }
 0x440   :  { %4600 = vmatmul.mubr.msk.f32.vlgmr.msra.gmra.mrb[4].mxu1 %vm72_vm1, %v4597_v61 }
 0x50b   :  { %v4285_v19 = vpop.f32.mrb[0].mxu1 }
 0x50c   :  { %v4438_v20 = vmul.f32 %v4285_v19, %v5118_v57  ;;  %v4287_v21 = vpop.f32.mrb[1].mxu1 }
 0x50d   :  { %v4439_v22 = vmul.f32 %v4287_v21, %v5120_v59 }
 0x50e   :  { %v4452_v23 = vmul.f32 %v4438_v20, %v4285_v19 }
 0x50f   :  { %v4444_v24 = vadd.f32 %v4439_v22, %v4438_v20  ;;  %v4453_v25 = vmul.f32 %v4439_v22, %v4287_v21  ;;  %v4356_v26 = vpop.f32.mrb[2].mxu1 }
 0x510   :  { %v4440_v8 = vmul.f32 %v4356_v26, %v5123_v9  ;;  %v4358_v27 = vpop.f32.mrb[3].mxu1 }
 0x511   :  { %v4458_v1 = vadd.f32 %v4453_v25, %v4452_v23  ;;  %v4441_v2 = vmul.f32 %v4358_v27, %v5126_v11  ;;  %v4760_v11 = vmov 2  }
 0x512   :  { %v4445_v28 = vadd.f32 %v4444_v24, %v4440_v8  ;;  %v4454_v4 = vmul.f32 %v4440_v8, %v4356_v26  ;;  %4713 = vset.pattern.permute.xlu1 %v4760_v11 }
 0x513   :  { %v4455_v0 = vmul.f32 %v4441_v2, %v4358_v27  ;;  %v4427_v15 = vpop.f32.mrb[4].mxu1 }
 0x514   :  { %v4459_v29 = vadd.f32 %v4458_v1, %v4454_v4  ;;  %v4446_v13 = vadd.f32 %v4445_v28, %v4441_v2  ;;  %v4442_v57 = vmul.f32 %v4427_v15, %v5129_v14  ;;  %v4429_v17 = vpop.f32.mrb[5].mxu1 }
 0x515   :  { %v4443_v59 = vmul.f32 %v4429_v17, %v5132_v16  ;;  %v4761_v16 = vmov 3  }
 0x516   :  { %v4460_v30 = vadd.f32 %v4459_v29, %v4455_v0  ;;  %v4447_v31 = vadd.f32 %v4446_v13, %v4442_v57  ;;  %v4456_v32 = vmul.f32 %v4442_v57, %v4427_v15  ;;  %4714 = vset.pattern.permute.xlu0 %v4761_v16 }
 0x517   :  { %v4457_v33 = vmul.f32 %v4443_v59, %v4429_v17 }
 0x518   :  { %v4461_v9 = vadd.f32 %v4460_v30, %v4456_v32  ;;  %v4448_v34 = vadd.f32 %v4447_v31, %v4443_v59 }
 0x51a   :  { %v4462_v35 = vadd.f32 %v4461_v9, %v4457_v33  ;;  %4449 = vadd.xlane.f32.xlu0 %v4448_v34 }
 0x51c   :  { %4463 = vadd.xlane.f32.xlu1 %v4462_v35 }
 0x5a7   :  { %v4450_v36 = vpop.xlane.xlu0 %4449 }
 0x5a8   :  { %v4451_v37 = vmul.f32 0.001953125, %v4450_v36 }
 0x5a9   :  { %v4464_v38 = vpop.xlane.xlu1 %4463 }
 0x5aa   :  { %v4466_v39 = vmul.f32 %v4451_v37, %v4451_v37  ;;  %v4465_v40 = vmul.f32 0.001953125, %v4464_v38 }
 0x5ac   :  { %v4467_v14 = vsub.f32 %v4465_v40, %v4466_v39 }
 0x5ae   :  { %v4468_v41 = vadd.f32 1e-05, %v4467_v14 }
 0x5b0   :  { %4717 = vrsqrt.f32 %v4468_v41 }
 0x5ba   :  { %v4718_v43 = vpop.eup %4717 }
 0x5bb   :  { %v4470_v44 = vmul.f32 %v4718_v43, %v5139_v42 }
 0x5bd   :  { %4479 = vperm.xlu1 %4713, %v4470_v44   ;;  %v4471_v45 = vmul.f32 %v4470_v44, %v4451_v37 }
 0x5bf   :  { %4473 = vrot.lane.b32.xlu0 %v4471_v45, %s4753_s8 }
 0x631   :  { %v4474_v46 = vpop.permute.xlu0 %4473 }
 0x632   :  { %v4476_v47 = vsub.f32 %v5139_v42, %v4474_v46 }
 0x634   :  { %4490 = vperm.xlu0 %4714, %v4476_v47  }
 0x63c   :  { %v4480_v48 = vpop.permute.xlu1 %4479 }
 0x63d   :  { %v4482_v49 = vmul.f32 %v4480_v48, %v4285_v19  ;;  %v4483_v50 = vmul.f32 %v4480_v48, %v4287_v21  ;;  %v4484_v51 = vmul.f32 %v4480_v48, %v4356_v26  ;;  %v4485_v52 = vmul.f32 %v4480_v48, %v4358_v27  ;;  %v4723_v19 = vld [vmem:[%s5479_s0 + $0x20] sm:$0xff]  ;;  %v4724_v21 = vld [vmem:[%s5479_s0 + $0x28] sm:$0xff] }
 0x63e   :  { %v4486_v53 = vmul.f32 %v4480_v48, %v4427_v15  ;;  %v4487_v54 = vmul.f32 %v4480_v48, %v4429_v17 }
 0x6b3   :  { %v4491_v55 = vpop.permute.xlu0 %4490 }
 0x6b4   :  { %v4493_v56 = vadd.f32 %v4491_v55, %v4482_v49  ;;  %v4494_v58 = vadd.f32 %v4491_v55, %v4483_v50  ;;  %v4495_v60 = vadd.f32 %v4491_v55, %v4484_v51  ;;  %v4496_v62 = vadd.f32 %v4491_v55, %v4485_v52 }
 0x6b5   :  { %v4497_v10 = vadd.f32 %v4491_v55, %v4486_v53  ;;  %v4498_v7 = vadd.f32 %v4491_v55, %v4487_v54 }
 0x6b6   :  { %v4499_v42 = vadd.f32 %v4719_v3, %v4493_v56  ;;  %v4500_v61 = vadd.f32 %v4720_v12, %v4494_v58  ;;  %v4501_v6 = vadd.f32 %v4721_v63, %v4495_v60  ;;  %v4502_v18 = vadd.f32 %v4722_v5, %v4496_v62 }
 0x6b7   :  { %v4503_v20 = vadd.f32 %v4723_v19, %v4497_v10  ;;  %v4504_v22 = vadd.f32 %v4724_v21, %v4498_v7 }
 0x6b8   :  { %v4505_v23 = vmax.f32 %v4499_v42, 0.0  ;;  %v4506_v24 = vmax.f32 %v4500_v61, 0.0  ;;  %v4507_v25 = vmax.f32 %v4501_v6, 0.0  ;;  %v4508_v26 = vmax.f32 %v4502_v18, 0.0 }
 0x6b9   :  { %v4509_v8 = vmax.f32 %v4503_v20, 0.0  ;;  %v4510_v27 = vmax.f32 %v4504_v22, 0.0 }
 0x6ba   :  { %4511 = vst [vmem:[#allocation2] sm:$0xff] %v4505_v23  ;;  %4512 = vst [vmem:[#allocation2 + $0x8] sm:$0xff] %v4506_v24 }
 0x6bb   :  { %4513 = vst [vmem:[#allocation2 + $0x10] sm:$0xff] %v4507_v25  ;;  %4514 = vst [vmem:[#allocation2 + $0x18] sm:$0xff] %v4508_v26 }
 0x6bc   :  { %4515 = vst [vmem:[#allocation2 + $0x20] sm:$0xff] %v4509_v8  ;;  %4516 = vst [vmem:[#allocation2 + $0x28] sm:$0xff] %v4510_v27 }
 0x6bd   :  { %4736 = shalt.err (!%p4733_p4)
}
 0x6be   :  { %s4737_s10 = scalar_lea.hbm %s5484_s5, 768 }
 0x6bf   :  { %p4738_p5 = scmp.ne.s32.totalorder %s5484_s5, %s4737_s10  ;;  %p4741_p6 = scmp.lt.u32.totalorder %s4737_s10, %s5484_s5 }
 0x6c1   :  { %p4743_p7 = pnand %p4741_p6, %p4738_p5 }
 0x6c3   :  { %4746 = shalt.err (!%p4743_p7)
}
 0x6c4   :  { %4526 = dma.vmem_to_hbm [thread:$0]  %s4524_s1, 768, %s5484_s5, [#allocation3]  }
 0x6c5   :  { %4747 = dma.done.wait [#allocation3], 768  }
 0x6c6   :  { %4748 = vsyncadd [#allocation3], 4294966528 }
 0x6c7   :  { %4530 = vsyncpa [#allocation3], 1 }

</bundles_post_ra>
